<compile_context>
chip_gen: v7x
topology: tpu7x:2x2x1
jax: 0.10.0
libtpu: 0.0.40
codegen_flags: <defaults>
</compile_context>

<pallas_src>
import functools

import jax
import jax.numpy as jnp
from jax.experimental import pallas as pl
from jax.experimental.pallas import tpu as pltpu


def _nnue_kernel(x1_ref, x2_ref,
                 w_in_ref, b_in_ref,
                 w1a_ref, w1b_ref, b1_ref,
                 w2_ref, b2_ref,
                 wo_ref, bo_ref,
                 out_ref):
    # ---- feature transformer (shared input layer), both perspectives ----------
    w_in = w_in_ref[...]                                    # (F, L1) bf16, resident
    b_in = b_in_ref[...]                                    # (1, L1) f32

    h1 = jnp.dot(x1_ref[...], w_in, preferred_element_type=jnp.float32)
    h1 = jnp.clip(h1 + b_in, 0.0, 1.0).astype(jnp.bfloat16)  # (TB, L1)

    h2 = jnp.dot(x2_ref[...], w_in, preferred_element_type=jnp.float32)
    h2 = jnp.clip(h2 + b_in, 0.0, 1.0).astype(jnp.bfloat16)  # (TB, L1)

    # ---- l1:  concat([h1, h2], 1) @ W1  ==  h1 @ W1[:L1] + h2 @ W1[L1:] --------
    a = jnp.dot(h1, w1a_ref[...], preferred_element_type=jnp.float32)
    a = a + jnp.dot(h2, w1b_ref[...], preferred_element_type=jnp.float32)
    a = jnp.clip(a + b1_ref[...], 0.0, 1.0).astype(jnp.bfloat16)  # (TB, L2)

    # ---- l2 --------------------------------------------------------------------
    a = jnp.dot(a, w2_ref[...], preferred_element_type=jnp.float32)
    a = jnp.clip(a + b2_ref[...], 0.0, 1.0).astype(jnp.bfloat16)  # (TB, L3)

    # ---- output layer, lane-dense: (1, L3) x (TB, L3) contract L3 -> (1, TB) ---
    out = jax.lax.dot_general(
        wo_ref[...], a,
        dimension_numbers=(((1,), (1,)), ((), ())),
        preferred_element_type=jnp.float32)
    out_ref[...] = out + bo_ref[...]                         # (1, TB)


def _round_up(x, m):
    return ((x + m - 1) // m) * m


def nnue_halfkp_forward(x1, x2, params, *, tb=256):
    """NNUE HalfKP forward pass in one pipelined Pallas kernel.

    x1, x2: (B, F) dense binary HalfKP feature vectors.
    params: dict with w_in (F,L1), b_in (1,L1), w1 (2*L1,L2), b1 (1,L2),
            w2 (L2,L3), b2 (1,L3), w_out (L3,1), b_out (1,1).
    tb: batch tile (rows per grid step). 256 fits v7x's 64 MiB VMEM comfortably;
        bump toward 512 on v5e/v6e (128 MiB) for better HBM roofline.
    """
    B, F = x1.shape
    L1 = params["w_in"].shape[1]
    L2 = params["w1"].shape[1]
    L3 = params["w2"].shape[1]

    # Don't waste compute on tiny batches; keep tb a multiple of 128 so the
    # lane-dense (1, tb) output block stays unmasked.
    tb = min(tb, max(128, _round_up(B, 128)))

    bf16 = jnp.bfloat16
    f32 = jnp.float32
    # Binary inputs are exact in bf16; weights tolerate bf16 (f32 accumulation).
    x1b = x1.astype(bf16)
    x2b = x2.astype(bf16)
    w_in = params["w_in"].astype(bf16)
    b_in = params["b_in"].reshape(1, L1).astype(f32)
    w1 = params["w1"].astype(bf16)
    w1a = w1[:L1, :]                                  # perspective-1 half of W1
    w1b = w1[L1:, :]                                  # perspective-2 half of W1
    b1 = params["b1"].reshape(1, L2).astype(f32)
    w2 = params["w2"].astype(bf16)
    b2 = params["b2"].reshape(1, L3).astype(f32)
    wo = params["w_out"].reshape(1, L3).astype(bf16)  # row vector -> lane-dense out
    bo = params["b_out"].reshape(1, 1).astype(f32)

    nt = -(-B // tb)
    b_pad = nt * tb
    if b_pad != B:
        x1b = jnp.pad(x1b, ((0, b_pad - B), (0, 0)))
        x2b = jnp.pad(x2b, ((0, b_pad - B), (0, 0)))

    # x tiles step with the grid; all weight/bias blocks use constant index maps
    # so they are fetched once and stay VMEM-resident across the batch loop.
    in_specs = [
        pl.BlockSpec((tb, F), lambda i: (i, 0)),       # x1 tile
        pl.BlockSpec((tb, F), lambda i: (i, 0)),       # x2 tile
        pl.BlockSpec((F, L1), lambda i: (0, 0)),       # w_in (resident)
        pl.BlockSpec((1, L1), lambda i: (0, 0)),       # b_in
        pl.BlockSpec((L1, L2), lambda i: (0, 0)),      # w1[:L1]
        pl.BlockSpec((L1, L2), lambda i: (0, 0)),      # w1[L1:]
        pl.BlockSpec((1, L2), lambda i: (0, 0)),       # b1
        pl.BlockSpec((L2, L3), lambda i: (0, 0)),      # w2
        pl.BlockSpec((1, L3), lambda i: (0, 0)),       # b2
        pl.BlockSpec((1, L3), lambda i: (0, 0)),       # w_out row
        pl.BlockSpec((1, 1), lambda i: (0, 0)),        # b_out
    ]
    out_specs = pl.BlockSpec((1, tb), lambda i: (0, i))  # lane-dense output slab

    # VMEM budget: resident weights (assume 2 buffers each) + double-buffered
    # x tiles + in-kernel f32/bf16 temps, with 2x headroom, clamped to 64 MiB
    # (the smallest per-TC VMEM across v5e/v6e/v7x).
    bytes_w = 2 * ((F * L1 + 2 * L1 * L2 + L2 * L3 + L3) * 2
                   + (L1 + L2 + L3 + 1) * 4)
    bytes_x = 2 * 2 * (tb * F * 2)
    bytes_tmp = 6 * tb * max(L1, L2, L3) * 4 + 2 * tb * 4
    vmem_limit = int(min(max(2 * (bytes_w + bytes_x + bytes_tmp), 32 << 20),
                         64 << 20))

    out = pl.pallas_call(
        _nnue_kernel,
        out_shape=jax.ShapeDtypeStruct((1, b_pad), jnp.float32),
        grid_spec=pltpu.PrefetchScalarGridSpec(
            num_scalar_prefetch=0,
            grid=(nt,),
            in_specs=in_specs,
            out_specs=out_specs,
        ),
        compiler_params=pltpu.CompilerParams(
            dimension_semantics=("parallel",),
            vmem_limit_bytes=vmem_limit,
        ),
    )(x1b, x2b, w_in, b_in, w1a, w1b, b1, w2, b2, wo, bo)

    return out.reshape(b_pad, 1)[:B]


def init_params(key, features_num, L1, L2, L3):
    """PyTorch nn.Linear-style init (U(-1/sqrt(fan_in), 1/sqrt(fan_in))).
    Weights stored as (in, out) so the kernel computes x @ W + b."""
    def linear(k, fan_in, fan_out):
        kw, kb = jax.random.split(k)
        bound = 1.0 / jnp.sqrt(float(fan_in))
        w = jax.random.uniform(kw, (fan_in, fan_out), jnp.float32, -bound, bound)
        b = jax.random.uniform(kb, (1, fan_out), jnp.float32, -bound, bound)
        return w, b

    k0, k1, k2, k3 = jax.random.split(key, 4)
    w_in, b_in = linear(k0, features_num, L1)
    w1, b1 = linear(k1, 2 * L1, L2)
    w2, b2 = linear(k2, L2, L3)
    w_out, b_out = linear(k3, L3, 1)
    return dict(w_in=w_in, b_in=b_in, w1=w1, b1=b1,
                w2=w2, b2=b2, w_out=w_out, b_out=b_out)


def reference_forward(x1, x2, p):
    """Pure-JAX reference mirroring the kernel's numerics (bf16 operands, f32 accum)."""
    bf, f32 = jnp.bfloat16, jnp.float32
    w_in, w1, w2, wo = (p["w_in"].astype(bf), p["w1"].astype(bf),
                        p["w2"].astype(bf), p["w_out"].astype(bf))
    h1 = jnp.dot(x1.astype(bf), w_in, preferred_element_type=f32) + p["b_in"]
    h2 = jnp.dot(x2.astype(bf), w_in, preferred_element_type=f32) + p["b_in"]
    h = jnp.clip(jnp.concatenate([h1, h2], axis=1), 0.0, 1.0)
    h = jnp.clip(jnp.dot(h.astype(bf), w1, preferred_element_type=f32) + p["b1"], 0.0, 1.0)
    h = jnp.clip(jnp.dot(h.astype(bf), w2, preferred_element_type=f32) + p["b2"], 0.0, 1.0)
    return jnp.dot(h.astype(bf), wo, preferred_element_type=f32) + p["b_out"]


if __name__ == "__main__":
    # Small synthetic shapes consistent with the module (real HalfKP F ~ 41k).
    B = 8
    features_num = 384
    L1, L2, L3 = 256, 32, 32

    key = jax.random.PRNGKey(0)
    kx1, kx2, kp = jax.random.split(key, 3)
    # HalfKP inputs are sparse binary feature vectors.
    x1 = (jax.random.uniform(kx1, (B, features_num)) < 0.08).astype(jnp.float32)
    x2 = (jax.random.uniform(kx2, (B, features_num)) < 0.08).astype(jnp.float32)
    params = init_params(kp, features_num, L1, L2, L3)

    out = nnue_halfkp_forward(x1, x2, params)
    out = jax.block_until_ready(out)

    ref = reference_forward(x1, x2, params)
    assert out.shape == (B, 1)
    assert jnp.allclose(out, ref, atol=5e-3, rtol=1e-2), "mismatch vs reference"

    print("KERNEL_OK")
</pallas_src>

<mosaic_0001>
module attributes {stable_mosaic.version = 11 : i64} {
  func.func @_nnue_kernel(%arg0: i32, %arg1: memref<128x384xbf16, #tpu.memory_space<vmem>>, %arg2: memref<128x384xbf16, #tpu.memory_space<vmem>>, %arg3: memref<384x256xbf16, #tpu.memory_space<vmem>>, %arg4: memref<1x256xf32, #tpu.memory_space<vmem>>, %arg5: memref<256x32xbf16, #tpu.memory_space<vmem>>, %arg6: memref<256x32xbf16, #tpu.memory_space<vmem>>, %arg7: memref<1x32xf32, #tpu.memory_space<vmem>>, %arg8: memref<32x32xbf16, #tpu.memory_space<vmem>>, %arg9: memref<1x32xf32, #tpu.memory_space<vmem>>, %arg10: memref<1x32xbf16, #tpu.memory_space<vmem>>, %arg11: memref<1x1xf32, #tpu.memory_space<vmem>>, %arg12: memref<1x128xf32, #tpu.memory_space<vmem>>) attributes {dimension_semantics = [#tpu.dimension_semantics<parallel>], iteration_bounds = array<i64: 1>, scalar_prefetch = 0 : i64, scratch_operands = 0 : i64, tpu.core_type = #tpu.core_type<tc>, window_params = [{transform_indices = @transform_0, window_bounds = array<i64: 128, 384>}, {transform_indices = @transform_1, window_bounds = array<i64: 128, 384>}, {pipeline_mode = #tpu.pipeline_mode<synchronous>, transform_indices = @transform_2, window_bounds = array<i64: 384, 256>}, {pipeline_mode = #tpu.pipeline_mode<synchronous>, transform_indices = @transform_3, window_bounds = array<i64: 1, 256>}, {pipeline_mode = #tpu.pipeline_mode<synchronous>, transform_indices = @transform_4, window_bounds = array<i64: 256, 32>}, {pipeline_mode = #tpu.pipeline_mode<synchronous>, transform_indices = @transform_5, window_bounds = array<i64: 256, 32>}, {pipeline_mode = #tpu.pipeline_mode<synchronous>, transform_indices = @transform_6, window_bounds = array<i64: 1, 32>}, {pipeline_mode = #tpu.pipeline_mode<synchronous>, transform_indices = @transform_7, window_bounds = array<i64: 32, 32>}, {pipeline_mode = #tpu.pipeline_mode<synchronous>, transform_indices = @transform_8, window_bounds = array<i64: 1, 32>}, {pipeline_mode = #tpu.pipeline_mode<synchronous>, transform_indices = @transform_9, window_bounds = array<i64: 1, 32>}, {pipeline_mode = #tpu.pipeline_mode<synchronous>, transform_indices = @transform_10, window_bounds = array<i64: 1, 1>}, {transform_indices = @transform_11, window_bounds = array<i64: 1, 128>}]} {
    %c0 = arith.constant 0 : index
    %c0_0 = arith.constant 0 : index
    %0 = vector.load %arg3[%c0, %c0_0] : memref<384x256xbf16, #tpu.memory_space<vmem>>, vector<384x256xbf16>
    %c0_1 = arith.constant 0 : index
    %c0_2 = arith.constant 0 : index
    %1 = vector.load %arg4[%c0_1, %c0_2] : memref<1x256xf32, #tpu.memory_space<vmem>>, vector<1x256xf32>
    %c0_3 = arith.constant 0 : index
    %c0_4 = arith.constant 0 : index
    %2 = vector.load %arg1[%c0_3, %c0_4] : memref<128x384xbf16, #tpu.memory_space<vmem>>, vector<128x384xbf16>
    %cst = arith.constant dense<0.000000e+00> : vector<128x256xf32>
    %3 = tpu.matmul %2, %0, %cst {dimension_numbers = #tpu.dot_dimension_numbers<[1], [0], [0], [1], [0, 0, 1, 1], [], []>} : vector<128x384xbf16>, vector<384x256xbf16>, vector<128x256xf32> -> vector<128x256xf32>
    %4 = vector.broadcast %1 : vector<1x256xf32> to vector<128x256xf32>
    %5 = arith.addf %3, %4 : vector<128x256xf32>
    %cst_5 = arith.constant 0.000000e+00 : f32
    %cst_6 = arith.constant 1.000000e+00 : f32
    %6 = vector.broadcast %cst_5 : f32 to vector<128x256xf32>
    %7 = arith.maximumf %6, %5 : vector<128x256xf32>
    %8 = vector.broadcast %cst_6 : f32 to vector<128x256xf32>
    %9 = arith.minimumf %8, %7 : vector<128x256xf32>
    %10 = arith.truncf %9 : vector<128x256xf32> to vector<128x256xbf16>
    %c0_7 = arith.constant 0 : index
    %c0_8 = arith.constant 0 : index
    %11 = vector.load %arg2[%c0_7, %c0_8] : memref<128x384xbf16, #tpu.memory_space<vmem>>, vector<128x384xbf16>
    %cst_9 = arith.constant dense<0.000000e+00> : vector<128x256xf32>
    %12 = tpu.matmul %11, %0, %cst_9 {dimension_numbers = #tpu.dot_dimension_numbers<[1], [0], [0], [1], [0, 0, 1, 1], [], []>} : vector<128x384xbf16>, vector<384x256xbf16>, vector<128x256xf32> -> vector<128x256xf32>
    %13 = vector.broadcast %1 : vector<1x256xf32> to vector<128x256xf32>
    %14 = arith.addf %12, %13 : vector<128x256xf32>
    %cst_10 = arith.constant 0.000000e+00 : f32
    %cst_11 = arith.constant 1.000000e+00 : f32
    %15 = vector.broadcast %cst_10 : f32 to vector<128x256xf32>
    %16 = arith.maximumf %15, %14 : vector<128x256xf32>
    %17 = vector.broadcast %cst_11 : f32 to vector<128x256xf32>
    %18 = arith.minimumf %17, %16 : vector<128x256xf32>
    %19 = arith.truncf %18 : vector<128x256xf32> to vector<128x256xbf16>
    %c0_12 = arith.constant 0 : index
    %c0_13 = arith.constant 0 : index
    %20 = vector.load %arg5[%c0_12, %c0_13] : memref<256x32xbf16, #tpu.memory_space<vmem>>, vector<256x32xbf16>
    %cst_14 = arith.constant dense<0.000000e+00> : vector<128x32xf32>
    %21 = tpu.matmul %10, %20, %cst_14 {dimension_numbers = #tpu.dot_dimension_numbers<[1], [0], [0], [1], [0, 0, 1, 1], [], []>} : vector<128x256xbf16>, vector<256x32xbf16>, vector<128x32xf32> -> vector<128x32xf32>
    %c0_15 = arith.constant 0 : index
    %c0_16 = arith.constant 0 : index
    %22 = vector.load %arg6[%c0_15, %c0_16] : memref<256x32xbf16, #tpu.memory_space<vmem>>, vector<256x32xbf16>
    %cst_17 = arith.constant dense<0.000000e+00> : vector<128x32xf32>
    %23 = tpu.matmul %19, %22, %cst_17 {dimension_numbers = #tpu.dot_dimension_numbers<[1], [0], [0], [1], [0, 0, 1, 1], [], []>} : vector<128x256xbf16>, vector<256x32xbf16>, vector<128x32xf32> -> vector<128x32xf32>
    %24 = arith.addf %21, %23 : vector<128x32xf32>
    %c0_18 = arith.constant 0 : index
    %c0_19 = arith.constant 0 : index
    %25 = vector.load %arg7[%c0_18, %c0_19] : memref<1x32xf32, #tpu.memory_space<vmem>>, vector<1x32xf32>
    %26 = vector.broadcast %25 : vector<1x32xf32> to vector<128x32xf32>
    %27 = arith.addf %24, %26 : vector<128x32xf32>
    %cst_20 = arith.constant 0.000000e+00 : f32
    %cst_21 = arith.constant 1.000000e+00 : f32
    %28 = vector.broadcast %cst_20 : f32 to vector<128x32xf32>
    %29 = arith.maximumf %28, %27 : vector<128x32xf32>
    %30 = vector.broadcast %cst_21 : f32 to vector<128x32xf32>
    %31 = arith.minimumf %30, %29 : vector<128x32xf32>
    %32 = arith.truncf %31 : vector<128x32xf32> to vector<128x32xbf16>
    %c0_22 = arith.constant 0 : index
    %c0_23 = arith.constant 0 : index
    %33 = vector.load %arg8[%c0_22, %c0_23] : memref<32x32xbf16, #tpu.memory_space<vmem>>, vector<32x32xbf16>
    %cst_24 = arith.constant dense<0.000000e+00> : vector<128x32xf32>
    %34 = tpu.matmul %32, %33, %cst_24 {dimension_numbers = #tpu.dot_dimension_numbers<[1], [0], [0], [1], [0, 0, 1, 1], [], []>} : vector<128x32xbf16>, vector<32x32xbf16>, vector<128x32xf32> -> vector<128x32xf32>
    %c0_25 = arith.constant 0 : index
    %c0_26 = arith.constant 0 : index
    %35 = vector.load %arg9[%c0_25, %c0_26] : memref<1x32xf32, #tpu.memory_space<vmem>>, vector<1x32xf32>
    %36 = vector.broadcast %35 : vector<1x32xf32> to vector<128x32xf32>
    %37 = arith.addf %34, %36 : vector<128x32xf32>
    %cst_27 = arith.constant 0.000000e+00 : f32
    %cst_28 = arith.constant 1.000000e+00 : f32
    %38 = vector.broadcast %cst_27 : f32 to vector<128x32xf32>
    %39 = arith.maximumf %38, %37 : vector<128x32xf32>
    %40 = vector.broadcast %cst_28 : f32 to vector<128x32xf32>
    %41 = arith.minimumf %40, %39 : vector<128x32xf32>
    %42 = arith.truncf %41 : vector<128x32xf32> to vector<128x32xbf16>
    %c0_29 = arith.constant 0 : index
    %c0_30 = arith.constant 0 : index
    %43 = vector.load %arg10[%c0_29, %c0_30] : memref<1x32xbf16, #tpu.memory_space<vmem>>, vector<1x32xbf16>
    %cst_31 = arith.constant dense<0.000000e+00> : vector<1x128xf32>
    %44 = tpu.matmul %43, %42, %cst_31 {dimension_numbers = #tpu.dot_dimension_numbers<[1], [1], [0], [0], [0, 0, 1, 0], [], []>} : vector<1x32xbf16>, vector<128x32xbf16>, vector<1x128xf32> -> vector<1x128xf32>
    %c0_32 = arith.constant 0 : index
    %c0_33 = arith.constant 0 : index
    %45 = vector.load %arg11[%c0_32, %c0_33] : memref<1x1xf32, #tpu.memory_space<vmem>>, vector<1x1xf32>
    %46 = vector.broadcast %45 : vector<1x1xf32> to vector<1x128xf32>
    %47 = arith.addf %44, %46 : vector<1x128xf32>
    %c0_34 = arith.constant 0 : index
    %c0_35 = arith.constant 0 : index
    %48 = vector.load %arg12[%c0_34, %c0_35] : memref<1x128xf32, #tpu.memory_space<vmem>>, vector<1x128xf32>
    tpu.vector_store %arg12[%c0_34, %c0_35], %47 {strides = array<i32>} : memref<1x128xf32, #tpu.memory_space<vmem>>, vector<1x128xf32>,
    return
  }
  func.func @transform_0(%arg0: i32) -> (i32, i32) {
    %c0_i32 = arith.constant 0 : i32
    %c0_i32_0 = arith.constant 0 : i32
    return %arg0, %c0_i32 : i32, i32
  }
  func.func @transform_1(%arg0: i32) -> (i32, i32) {
    %c0_i32 = arith.constant 0 : i32
    %c0_i32_0 = arith.constant 0 : i32
    return %arg0, %c0_i32 : i32, i32
  }
  func.func @transform_2(%arg0: i32) -> (i32, i32) {
    %c0_i32 = arith.constant 0 : i32
    %c0_i32_0 = arith.constant 0 : i32
    %c0_i32_1 = arith.constant 0 : i32
    return %c0_i32, %c0_i32_0 : i32, i32
  }
  func.func @transform_3(%arg0: i32) -> (i32, i32) {
    %c0_i32 = arith.constant 0 : i32
    %c0_i32_0 = arith.constant 0 : i32
    %c0_i32_1 = arith.constant 0 : i32
    return %c0_i32, %c0_i32_0 : i32, i32
  }
  func.func @transform_4(%arg0: i32) -> (i32, i32) {
    %c0_i32 = arith.constant 0 : i32
    %c0_i32_0 = arith.constant 0 : i32
    %c0_i32_1 = arith.constant 0 : i32
    return %c0_i32, %c0_i32_0 : i32, i32
  }
  func.func @transform_5(%arg0: i32) -> (i32, i32) {
    %c0_i32 = arith.constant 0 : i32
    %c0_i32_0 = arith.constant 0 : i32
    %c0_i32_1 = arith.constant 0 : i32
    return %c0_i32, %c0_i32_0 : i32, i32
  }
  func.func @transform_6(%arg0: i32) -> (i32, i32) {
    %c0_i32 = arith.constant 0 : i32
    %c0_i32_0 = arith.constant 0 : i32
    %c0_i32_1 = arith.constant 0 : i32
    return %c0_i32, %c0_i32_0 : i32, i32
  }
  func.func @transform_7(%arg0: i32) -> (i32, i32) {
    %c0_i32 = arith.constant 0 : i32
    %c0_i32_0 = arith.constant 0 : i32
    %c0_i32_1 = arith.constant 0 : i32
    return %c0_i32, %c0_i32_0 : i32, i32
  }
  func.func @transform_8(%arg0: i32) -> (i32, i32) {
    %c0_i32 = arith.constant 0 : i32
    %c0_i32_0 = arith.constant 0 : i32
    %c0_i32_1 = arith.constant 0 : i32
    return %c0_i32, %c0_i32_0 : i32, i32
  }
  func.func @transform_9(%arg0: i32) -> (i32, i32) {
    %c0_i32 = arith.constant 0 : i32
    %c0_i32_0 = arith.constant 0 : i32
    %c0_i32_1 = arith.constant 0 : i32
    return %c0_i32, %c0_i32_0 : i32, i32
  }
  func.func @transform_10(%arg0: i32) -> (i32, i32) {
    %c0_i32 = arith.constant 0 : i32
    %c0_i32_0 = arith.constant 0 : i32
    %c0_i32_1 = arith.constant 0 : i32
    return %c0_i32, %c0_i32_0 : i32, i32
  }
  func.func @transform_11(%arg0: i32) -> (i32, i32) {
    %c0_i32 = arith.constant 0 : i32
    %c0_i32_0 = arith.constant 0 : i32
    return %c0_i32, %arg0 : i32, i32
  }
}

</mosaic_0001>

<bundles_post_ra>
// kernel: tpu_custom_call.1
= control target key start
LH: loop header
LB: loop body
LE: loop exit
PB: predicated region body
PF: predicated region fallthrough
CT: control target
= control target key end

     0   :  { %s3258_s0 = inlined_call_operand.vmem [shape: bf16[128,384], index: 0, kind: input, shape index: {}]   ;;  %s3259_s1 = inlined_call_operand.hbm [shape: bf16[128,384], index: 1, kind: input, shape index: {}]   ;;  %s3260_s2 = inlined_call_operand.hbm [shape: bf16[384,256], index: 2, kind: input, shape index: {}]   ;;  %s3261_s3 = inlined_call_operand.vmem [shape: f32[1,256], index: 3, kind: input, shape index: {}]   ;;  %s3262_s4 = inlined_call_operand.vmem [shape: bf16[256,32], index: 4, kind: input, shape index: {}]   ;;  %s3263_s5 = inlined_call_operand.vmem [shape: bf16[256,32], index: 5, kind: input, shape index: {}]   ;;  %s3264_s6 = inlined_call_operand.vmem [shape: f32[1,32], index: 6, kind: input, shape index: {}]   ;;  %s3265_s7 = inlined_call_operand.vmem [shape: bf16[32,32], index: 7, kind: input, shape index: {}]   ;;  %s3266_s8 = inlined_call_operand.vmem [shape: f32[1,32], index: 8, kind: input, shape index: {}]   ;;  %s3267_s9 = inlined_call_operand.vmem [shape: bf16[1,32], index: 9, kind: input, shape index: {}]   ;;  %s3268_s10 = inlined_call_operand.<no memory space> [shape: f32[1,1], index: 10, kind: input, shape index: {}]   ;;  %s3269_s11 = inlined_call_operand.hbm [shape: f32[1,128], index: 11, kind: output, shape index: {}]  }
   0x1   :  { %v16_v0 = vstv %s3268_s10 }
   0x2   :  { %17 = vst [vmem:[#allocation2] sm:$0x1] %v16_v0 }
   0x3   :  { %18 = vsyncpa [#allocation4], 0 }
   0x4   :  { %19 = vsyncpa [#allocation7], 0 }
   0x5   :  { %20 = vsyncpa [#allocation5], 0  ;;  %s2804_s19 = smov [#allocation3]   ;;  %s2732_s23 = scalar_lea.hbm %s3259_s1, 3072 }
   0x6   :  { %s28_s20 = sshll.u32 %s2804_s19, 4  ;;  %p2733_p0 = scmp.ne.s32.totalorder %s3259_s1, %s2732_s23  ;;  %s29_s20 = int_to_ptr.vmem [resolvable:$true] %s28_s20 }
   0x7   :  { %p2736_p1 = scmp.lt.u32.totalorder %s2732_s23, %s3259_s1 }
   0x9   :  { %p2738_p2 = pnand %p2736_p1, %p2733_p0 }
   0xb   :  { %2741 = shalt.err (!%p2738_p2)
}
   0xc   :  { %s2742_s10 = scalar_lea.vmem %s29_s20, 3072  ;;  %p2747_p4 = scmp.lt.s32.totalorder %s29_s20, %s29_s20 }
   0xd   :  { %p2743_p3 = scmp.ne.s32.totalorder %s29_s20, %s2742_s10  ;;  %p2748_p5 = scmp.lt.s32.totalorder %s2742_s10, %s2742_s10 }
   0xf   :  { %p2749_p6 = por %p2748_p5, %p2747_p4 }
  0x11   :  { %p2750_p7 = pnand %p2749_p6, %p2743_p3 }
  0x13   :  { %2753 = shalt.err (!%p2750_p7)
}
  0x14   :  { %s2805_s28 = smov 192   ;;  %s2806_s29 = smov 12  }
  0x15   :  { %34 = dma.hbm_to_vmem [thread:$0]  %s3259_s1, 3072, %s29_s20, [#allocation4], %s2805_s28, %s2805_s28, %s2806_s29  }
  0x16   :  { %s2807_s13 = smov [#allocation6]   ;;  %s2754_s17 = scalar_lea.hbm %s3260_s2, 6144 }
  0x17   :  { %s40_s14 = sshll.u32 %s2807_s13, 4  ;;  %p2755_p8 = scmp.ne.s32.totalorder %s3260_s2, %s2754_s17  ;;  %s41_s14 = int_to_ptr.vmem [resolvable:$true] %s40_s14 }
  0x18   :  { %p2758_p9 = scmp.lt.u32.totalorder %s2754_s17, %s3260_s2 }
  0x1a   :  { %p2760_p10 = pnand %p2758_p9, %p2755_p8 }
  0x1c   :  { %2763 = shalt.err (!%p2760_p10)
}
  0x1d   :  { %s2764_s23 = scalar_lea.vmem %s41_s14, 6144  ;;  %p2769_p12 = scmp.lt.s32.totalorder %s41_s14, %s41_s14 }
  0x1e   :  { %p2765_p11 = scmp.ne.s32.totalorder %s41_s14, %s2764_s23  ;;  %p2770_p13 = scmp.lt.s32.totalorder %s2764_s23, %s2764_s23 }
  0x20   :  { %p2771_p0 = por %p2770_p13, %p2769_p12 }
  0x22   :  { %p2772_p1 = pnand %p2771_p0, %p2765_p11 }
  0x24   :  { %2775 = shalt.err (!%p2772_p1)
}
  0x25   :  { %s2808_s1 = smov 128   ;;  %s2809_s20 = smov 8  }
  0x26   :  { %46 = dma.hbm_to_vmem [thread:$0]  %s3260_s2, 6144, %s41_s14, [#allocation7], %s2808_s1, %s2808_s1, %s2809_s20  }
  0x27   :  { %2798 = dma.done.wait [#allocation4], 3072  }
  0x28   :  { %2799 = vsyncadd [#allocation4], 4294964224 }
  0x29   :  { %2800 = dma.done.wait [#allocation7], 6144  }
  0x2a   :  { %2801 = vsyncadd [#allocation7], 4294961152  ;;  %v2810_v1 = vmov 0   ;;  %v2562_v2 = vld [vmem:[#allocation6 + $0x4] ss:$8 sps:$4 sm:$0xff]   ;;  %vm1838_vm0 = vcmask 261120  }
  0x2b   :  { %2561 = vset.pattern.permute.xlu0 %v2810_v1  ;;  %v2564_v3 = vld [vmem:[#allocation6] ss:$8 sps:$4 sm:$0xff]   ;;  %530 = vmatprep.subr.bf16.mxu0 %v2562_v2  ;;  %v2565_v4 = vld [vmem:[#allocation6 + $0x14] ss:$8 sps:$4 sm:$0xff]   ;;  %v2567_v5 = vld [vmem:[#allocation6 + $0x10] ss:$8 sps:$4 sm:$0xff]  }
  0x2c   :  { %996 = vmatprep.subr.bf16.mxu1 %v2562_v2  ;;  %531 = vmatpush1.bf16.msra.mxu0 %v2564_v3  ;;  %v2568_v6 = vld [vmem:[#allocation6 + $0x24] ss:$8 sps:$4 sm:$0xff]   ;;  %v2570_v7 = vld [vmem:[#allocation6 + $0x20] ss:$8 sps:$4 sm:$0xff]   ;;  %v2571_v8 = vld [vmem:[#allocation6 + $0x34] ss:$8 sps:$4 sm:$0xff]  }
  0x2d   :  { %997 = vmatpush1.bf16.msra.mxu1 %v2564_v3  ;;  %532 = vmatprep.subr.bf16.mxu0 %v2565_v4  ;;  %v2573_v9 = vld [vmem:[#allocation6 + $0x30] ss:$8 sps:$4 sm:$0xff]   ;;  %v2574_v10 = vld [vmem:[#allocation6 + $0x44] ss:$8 sps:$4 sm:$0xff]   ;;  %v2576_v11 = vld [vmem:[#allocation6 + $0x40] ss:$8 sps:$4 sm:$0xff]  }
  0x2e   :  { %998 = vmatprep.subr.bf16.mxu1 %v2565_v4  ;;  %v2577_v12 = vld [vmem:[#allocation6 + $0x54] ss:$8 sps:$4 sm:$0xff]   ;;  %v2579_v13 = vld [vmem:[#allocation6 + $0x50] ss:$8 sps:$4 sm:$0xff]   ;;  %v2580_v14 = vld [vmem:[#allocation6 + $0x64] ss:$8 sps:$4 sm:$0xff]  }
  0x2f   :  { %v2612_v15 = vld [vmem:[%s3258_s0 + $0x4] ss:$12 sps:$4 sm:$0xff]   ;;  %v2583_v18 = vld [vmem:[#allocation6 + $0x74] ss:$8 sps:$4 sm:$0xff]   ;;  %vm2812_vm1 = vmmov 0   ;;  %s2813_s12 = smov [#allocation8]  }
  0x30   :  { %533 = vmatpush1.bf16.msra.mxu0 %v2567_v5  ;;  %v2582_v16 = vld [vmem:[#allocation6 + $0x60] ss:$8 sps:$4 sm:$0xff]   ;;  %v2615_v17 = vld [vmem:[#allocation3 + $0x4] ss:$12 sps:$4 sm:$0xff]   ;;  %562 = vmatprep.mubr.bf16.mxu0 %v2612_v15  ;;  %v2589_v22 = vld [vmem:[#allocation6 + $0x94] ss:$8 sps:$4 sm:$0xff]  }
  0x31   :  { %999 = vmatpush1.bf16.msra.mxu1 %v2567_v5  ;;  %534 = vmatprep.subr.bf16.mxu0 %v2568_v6  ;;  %v2585_v19 = vld [vmem:[#allocation6 + $0x70] ss:$8 sps:$4 sm:$0xff]   ;;  %v2586_v20 = vld [vmem:[#allocation6 + $0x84] ss:$8 sps:$4 sm:$0xff]   ;;  %v2588_v21 = vld [vmem:[#allocation6 + $0x80] ss:$8 sps:$4 sm:$0xff]  }
  0x32   :  { %1000 = vmatprep.subr.bf16.mxu1 %v2568_v6  ;;  %1028 = vmatprep.mubr.bf16.mxu1 %v2615_v17  ;;  %v2591_v23 = vld [vmem:[#allocation6 + $0x90] ss:$8 sps:$4 sm:$0xff]   ;;  %v2592_v24 = vld [vmem:[#allocation6 + $0xa4] ss:$8 sps:$4 sm:$0xff]   ;;  %v2594_v25 = vld [vmem:[#allocation6 + $0xa0] ss:$8 sps:$4 sm:$0xff]  }
  0x33   :  { %v2595_v26 = vld [vmem:[#allocation6 + $0xb4] ss:$8 sps:$4 sm:$0xff]   ;;  %v2597_v27 = vld [vmem:[#allocation6 + $0xb0] ss:$8 sps:$4 sm:$0xff]   ;;  %v2598_v28 = vld [vmem:[#allocation6 + $0xc4] ss:$8 sps:$4 sm:$0xff]  }
  0x34   :  { %535 = vmatpush1.bf16.msra.mxu0 %v2570_v7  ;;  %v2600_v29 = vld [vmem:[#allocation6 + $0xc0] ss:$8 sps:$4 sm:$0xff]   ;;  %v2601_v30 = vld [vmem:[#allocation6 + $0xd4] ss:$8 sps:$4 sm:$0xff]   ;;  %v2603_v31 = vld [vmem:[#allocation6 + $0xd0] ss:$8 sps:$4 sm:$0xff]  }
  0x35   :  { %1001 = vmatpush1.bf16.msra.mxu1 %v2570_v7  ;;  %536 = vmatprep.subr.bf16.mxu0 %v2571_v8  ;;  %v2604_v32 = vld [vmem:[#allocation6 + $0xe4] ss:$8 sps:$4 sm:$0xff]   ;;  %v2606_v33 = vld [vmem:[#allocation6 + $0xe0] ss:$8 sps:$4 sm:$0xff]   ;;  %v2607_v34 = vld [vmem:[#allocation6 + $0xf4] ss:$8 sps:$4 sm:$0xff]  }
  0x36   :  { %1002 = vmatprep.subr.bf16.mxu1 %v2571_v8  ;;  %v2609_v35 = vld [vmem:[#allocation6 + $0xf0] ss:$8 sps:$4 sm:$0xff]   ;;  %v2610_v36 = vld [vmem:[%s3258_s0] ss:$12 sps:$4 sm:$0xff]   ;;  %s2085_s13 = sshll.u32 %s2813_s12, 4  ;;  %s2086_s13 = int_to_ptr.vmem [resolvable:$true] %s2085_s13 }
  0x37   :  { %v2618_v37 = vld [vmem:[#allocation6 + $0x104] ss:$8 sps:$4 sm:$0xff]   ;;  %v2616_v39 = vld [vmem:[#allocation6 + $0x100] ss:$8 sps:$4 sm:$0xff]   ;;  %v2626_v42 = vld [vmem:[#allocation6 + $0x114] ss:$8 sps:$4 sm:$0xff]   ;;  %p2781_p3 = scmp.lt.s32.totalorder %s2086_s13, %s2086_s13 }
  0x38   :  { %537 = vmatpush1.bf16.msra.mxu0 %v2573_v9  ;;  %v2613_v38 = vld [vmem:[#allocation3] ss:$12 sps:$4 sm:$0xff]   ;;  %v2619_v40 = vld [vmem:[%s3258_s0 + $0x1c] ss:$12 sps:$4 sm:$0xff]   ;;  %s2776_s14 = scalar_lea.vmem %s2086_s13, 16  ;;  %s2780_s15 = scalar_lea.vmem %s2086_s13, 32 }
  0x39   :  { %1003 = vmatpush1.bf16.msra.mxu1 %v2573_v9  ;;  %538 = vmatprep.subr.bf16.mxu0 %v2574_v10  ;;  %v2621_v41 = vld [vmem:[#allocation3 + $0x1c] ss:$12 sps:$4 sm:$0xff]   ;;  %v2624_v43 = vld [vmem:[#allocation6 + $0x110] ss:$8 sps:$4 sm:$0xff]   ;;  %v2635_v45 = vld [vmem:[#allocation6 + $0x124] ss:$8 sps:$4 sm:$0xff]   ;;  %p2777_p2 = scmp.ne.s32.totalorder %s2086_s13, %s2776_s14  ;;  %p2782_p4 = scmp.lt.s32.totalorder %s2780_s15, %s2776_s14 }
  0x3a   :  { %1004 = vmatprep.subr.bf16.mxu1 %v2574_v10  ;;  %v2623_v44 = vld [vmem:[%s3258_s0 + $0x18] ss:$12 sps:$4 sm:$0xff]   ;;  %v2628_v47 = vld [vmem:[%s3258_s0 + $0x34] ss:$12 sps:$4 sm:$0xff]   ;;  %v2632_v51 = vld [vmem:[%s3258_s0 + $0x30] ss:$12 sps:$4 sm:$0xff]  }
  0x3b   :  { %v2627_v46 = vld [vmem:[#allocation3 + $0x18] ss:$12 sps:$4 sm:$0xff]   ;;  %v2630_v48 = vld [vmem:[#allocation3 + $0x34] ss:$12 sps:$4 sm:$0xff]   ;;  %v2636_v52 = vld [vmem:[#allocation3 + $0x30] ss:$12 sps:$4 sm:$0xff]   ;;  %p2783_p5 = por %p2782_p4, %p2781_p3 }
  0x3c   :  { %539 = vmatpush1.bf16.msra.mxu0 %v2576_v11  ;;  %v2633_v49 = vld [vmem:[#allocation6 + $0x120] ss:$8 sps:$4 sm:$0xff]   ;;  %v2644_v50 = vld [vmem:[#allocation6 + $0x134] ss:$8 sps:$4 sm:$0xff]   ;;  %v2642_v53 = vld [vmem:[#allocation6 + $0x130] ss:$8 sps:$4 sm:$0xff]  }
  0x3d   :  { %1005 = vmatpush1.bf16.msra.mxu1 %v2576_v11  ;;  %540 = vmatprep.subr.bf16.mxu0 %v2577_v12  ;;  %v2653_v54 = vld [vmem:[#allocation6 + $0x144] ss:$8 sps:$4 sm:$0xff]   ;;  %v2651_v57 = vld [vmem:[#allocation6 + $0x140] ss:$8 sps:$4 sm:$0xff]   ;;  %v2662_v58 = vld [vmem:[#allocation6 + $0x154] ss:$8 sps:$4 sm:$0xff]   ;;  %p2784_p6 = pnand %p2783_p5, %p2777_p2 }
  0x3e   :  { %1006 = vmatprep.subr.bf16.mxu1 %v2577_v12  ;;  %v2637_v55 = vld [vmem:[%s3258_s0 + $0x4c] ss:$12 sps:$4 sm:$0xff]   ;;  %v2641_v59 = vld [vmem:[%s3258_s0 + $0x48] ss:$12 sps:$4 sm:$0xff]   ;;  %v2646_v63 = vld [vmem:[%s3258_s0 + $0x64] ss:$12 sps:$4 sm:$0xff]  }
  0x3f   :  { %v2639_v56 = vld [vmem:[#allocation3 + $0x4c] ss:$12 sps:$4 sm:$0xff]   ;;  %v2645_v60 = vld [vmem:[#allocation3 + $0x48] ss:$12 sps:$4 sm:$0xff]   ;;  %v2648_v0 = vld [vmem:[#allocation3 + $0x64] ss:$12 sps:$4 sm:$0xff]  }
  0x40   :  { %541 = vmatpush1.bf16.msra.mxu0 %v2579_v13  ;;  %v2660_v61 = vld [vmem:[#allocation6 + $0x150] ss:$8 sps:$4 sm:$0xff]   ;;  %v2671_v62 = vld [vmem:[#allocation6 + $0x164] ss:$8 sps:$4 sm:$0xff]   ;;  %v2669_v2 = vld [vmem:[#allocation6 + $0x160] ss:$8 sps:$4 sm:$0xff]  }
  0x41   :  { %1007 = vmatpush1.bf16.msra.mxu1 %v2579_v13  ;;  %542 = vmatprep.subr.bf16.mxu0 %v2580_v14  ;;  %v2680_v3 = vld [vmem:[#allocation6 + $0x174] ss:$8 sps:$4 sm:$0xff]   ;;  %v2678_v4 = vld [vmem:[#allocation6 + $0x170] ss:$8 sps:$4 sm:$0xff]   ;;  %v2654_v6 = vld [vmem:[#allocation3 + $0x60] ss:$12 sps:$4 sm:$0xff]  }
  0x42   :  { %1008 = vmatprep.subr.bf16.mxu1 %v2580_v14  ;;  %v2650_v5 = vld [vmem:[%s3258_s0 + $0x60] ss:$12 sps:$4 sm:$0xff]   ;;  %v2655_v9 = vld [vmem:[%s3258_s0 + $0x7c] ss:$12 sps:$4 sm:$0xff]   ;;  %v2659_v11 = vld [vmem:[%s3258_s0 + $0x78] ss:$12 sps:$4 sm:$0xff]  }
  0x43   :  { %v2698_v7 = vld [vmem:[%s3263_s5 + $0x40] sm:$0xff]   ;;  %v2668_v15 = vld [vmem:[%s3258_s0 + $0x90] ss:$12 sps:$4 sm:$0xff]   ;;  %v2673_v17 = vld [vmem:[%s3258_s0 + $0xac] ss:$12 sps:$4 sm:$0xff]  }
  0x44   :  { %543 = vmatpush1.bf16.msra.mxu0 %v2582_v16  ;;  %v2699_v8 = vld [vmem:[%s3262_s4 + $0x40] sm:$0xff]  }
  0x45   :  { %1009 = vmatpush1.bf16.msra.mxu1 %v2582_v16  ;;  %544 = vmatprep.subr.bf16.mxu0 %v2583_v18  ;;  %v2657_v10 = vld [vmem:[#allocation3 + $0x7c] ss:$12 sps:$4 sm:$0xff]   ;;  %v2663_v12 = vld [vmem:[#allocation3 + $0x78] ss:$12 sps:$4 sm:$0xff]   ;;  %v2666_v14 = vld [vmem:[#allocation3 + $0x94] ss:$12 sps:$4 sm:$0xff]  }
  0x46   :  { %1010 = vmatprep.subr.bf16.mxu1 %v2583_v18  ;;  %v2664_v13 = vld [vmem:[%s3258_s0 + $0x94] ss:$12 sps:$4 sm:$0xff]   ;;  %v2675_v18 = vld [vmem:[#allocation3 + $0xac] ss:$12 sps:$4 sm:$0xff]  }
  0x47   :  { %v2672_v16 = vld [vmem:[#allocation3 + $0x90] ss:$12 sps:$4 sm:$0xff]  }
  0x48   :  { %545 = vmatpush1.bf16.msra.mxu0 %v2585_v19 }
  0x49   :  { %1011 = vmatpush1.bf16.msra.mxu1 %v2585_v19  ;;  %546 = vmatprep.subr.bf16.mxu0 %v2586_v20  ;;  %v2677_v19 = vld [vmem:[%s3258_s0 + $0xa8] ss:$12 sps:$4 sm:$0xff]  }
  0x4a   :  { %1012 = vmatprep.subr.bf16.mxu1 %v2586_v20  ;;  %v2681_v20 = vld [vmem:[#allocation3 + $0xa8] ss:$12 sps:$4 sm:$0xff]  }
  0x4c   :  { %547 = vmatpush1.bf16.msra.mxu0 %v2588_v21 }
  0x4d   :  { %1013 = vmatpush1.bf16.msra.mxu1 %v2588_v21  ;;  %548 = vmatprep.subr.bf16.mxu0 %v2589_v22  ;;  %v2682_v21 = vld [vmem:[%s3258_s0 + $0x8] ss:$12 sps:$4 sm:$0xff]  }
  0x4e   :  { %1014 = vmatprep.subr.bf16.mxu1 %v2589_v22  ;;  %v2683_v22 = vld [vmem:[#allocation3 + $0x8] ss:$12 sps:$4 sm:$0xff]  }
  0x50   :  { %549 = vmatpush1.bf16.msra.mxu0 %v2591_v23 }
  0x51   :  { %1015 = vmatpush1.bf16.msra.mxu1 %v2591_v23  ;;  %550 = vmatprep.subr.bf16.mxu0 %v2592_v24  ;;  %v2700_v23 = vld [vmem:[%s3263_s5] sm:$0xff]  }
  0x52   :  { %1016 = vmatprep.subr.bf16.mxu1 %v2592_v24  ;;  %v2701_v24 = vld [vmem:[%s3262_s4] sm:$0xff]  }
  0x54   :  { %551 = vmatpush1.bf16.msra.mxu0 %v2594_v25 }
  0x55   :  { %1017 = vmatpush1.bf16.msra.mxu1 %v2594_v25  ;;  %552 = vmatprep.subr.bf16.mxu0 %v2595_v26  ;;  %v2702_v25 = vld [vmem:[%s3263_s5 + $0x48] sm:$0xff]  }
  0x56   :  { %1018 = vmatprep.subr.bf16.mxu1 %v2595_v26  ;;  %v2703_v26 = vld [vmem:[%s3262_s4 + $0x48] sm:$0xff]  }
  0x58   :  { %553 = vmatpush1.bf16.msra.mxu0 %v2597_v27 }
  0x59   :  { %1019 = vmatpush1.bf16.msra.mxu1 %v2597_v27  ;;  %554 = vmatprep.subr.bf16.mxu0 %v2598_v28  ;;  %v2704_v27 = vld [vmem:[%s3263_s5 + $0x8] sm:$0xff]  }
  0x5a   :  { %1020 = vmatprep.subr.bf16.mxu1 %v2598_v28  ;;  %v2705_v28 = vld [vmem:[%s3262_s4 + $0x8] sm:$0xff]  }
  0x5c   :  { %555 = vmatpush1.bf16.msra.mxu0 %v2600_v29 }
  0x5d   :  { %1021 = vmatpush1.bf16.msra.mxu1 %v2600_v29  ;;  %556 = vmatprep.subr.bf16.mxu0 %v2601_v30  ;;  %v2706_v29 = vld [vmem:[%s3263_s5 + $0x50] sm:$0xff]  }
  0x5e   :  { %1022 = vmatprep.subr.bf16.mxu1 %v2601_v30  ;;  %v2707_v30 = vld [vmem:[%s3262_s4 + $0x50] sm:$0xff]  }
  0x60   :  { %557 = vmatpush1.bf16.msra.mxu0 %v2603_v31 }
  0x61   :  { %1023 = vmatpush1.bf16.msra.mxu1 %v2603_v31  ;;  %558 = vmatprep.subr.bf16.mxu0 %v2604_v32  ;;  %v2684_v31 = vld [vmem:[%s3258_s0 + $0x20] ss:$12 sps:$4 sm:$0xff]  }
  0x62   :  { %1024 = vmatprep.subr.bf16.mxu1 %v2604_v32  ;;  %v2685_v32 = vld [vmem:[#allocation3 + $0x20] ss:$12 sps:$4 sm:$0xff]  }
  0x64   :  { %559 = vmatpush1.bf16.msra.mxu0 %v2606_v33 }
  0x65   :  { %1025 = vmatpush1.bf16.msra.mxu1 %v2606_v33  ;;  %560 = vmatprep.subr.bf16.mxu0 %v2607_v34  ;;  %v2708_v33 = vld [vmem:[%s3263_s5 + $0x10] sm:$0xff]  }
  0x66   :  { %1026 = vmatprep.subr.bf16.mxu1 %v2607_v34  ;;  %v2709_v34 = vld [vmem:[%s3262_s4 + $0x10] sm:$0xff]  }
  0x68   :  { %561 = vmatpush1.bf16.msra.mxu0 %v2609_v35 }
  0x69   :  { %1027 = vmatpush1.bf16.msra.mxu1 %v2609_v35  ;;  %643 = vmatprep.subr.bf16.mxu0 %v2618_v37  ;;  %v2710_v35 = vld [vmem:[%s3263_s5 + $0x58] sm:$0xff]  }
  0x6a   :  { %1109 = vmatprep.subr.bf16.mxu1 %v2618_v37  ;;  %v2712_v37 = vld [vmem:[%s3263_s5 + $0x18] sm:$0xff]  }
  0x6b   :  { %563 = vmatmul.mubr.bf16.vlgmr.msra.gmra.mrb[0].mxu0 %v2610_v36  ;;  %v2711_v36 = vld [vmem:[%s3262_s4 + $0x58] sm:$0xff]  }
  0x6c   :  { %1029 = vmatmul.mubr.bf16.vlgmr.msra.gmra.mrb[0].mxu1 %v2613_v38  ;;  %644 = vmatpush1.bf16.msra.mxu0 %v2616_v39  ;;  %v2713_v38 = vld [vmem:[%s3262_s4 + $0x18] sm:$0xff]  }
  0x6d   :  { %1110 = vmatpush1.bf16.msra.mxu1 %v2616_v39  ;;  %572 = vmatprep.mubr.bf16.mxu0 %v2619_v40  ;;  %v2714_v39 = vld [vmem:[%s3263_s5 + $0x60] sm:$0xff]  }
  0x6e   :  { %1038 = vmatprep.mubr.bf16.mxu1 %v2621_v41  ;;  %645 = vmatprep.subr.bf16.mxu0 %v2626_v42  ;;  %v2715_v40 = vld [vmem:[%s3262_s4 + $0x60] sm:$0xff]  }
  0x6f   :  { %1111 = vmatprep.subr.bf16.mxu1 %v2626_v42  ;;  %v2686_v41 = vld [vmem:[%s3258_s0 + $0x38] ss:$12 sps:$4 sm:$0xff]  }
  0x70   :  { %646 = vmatpush1.bf16.msra.mxu0 %v2624_v43  ;;  %v2687_v42 = vld [vmem:[#allocation3 + $0x38] ss:$12 sps:$4 sm:$0xff]  }
  0x71   :  { %1112 = vmatpush1.bf16.msra.mxu1 %v2624_v43  ;;  %647 = vmatprep.subr.bf16.mxu0 %v2635_v45  ;;  %v2716_v43 = vld [vmem:[%s3263_s5 + $0x20] sm:$0xff]  }
  0x72   :  { %1113 = vmatprep.subr.bf16.mxu1 %v2635_v45  ;;  %v2718_v45 = vld [vmem:[%s3263_s5 + $0x68] sm:$0xff]  }
  0x73   :  { %573 = vmatmul.mubr.bf16.gmra.mrb[4].mxu0 %v2623_v44  ;;  %v2717_v44 = vld [vmem:[%s3262_s4 + $0x20] sm:$0xff]  }
  0x74   :  { %1039 = vmatmul.mubr.bf16.gmra.mrb[4].mxu1 %v2627_v46  ;;  %582 = vmatprep.mubr.bf16.mxu0 %v2628_v47  ;;  %v2719_v46 = vld [vmem:[%s3262_s4 + $0x68] sm:$0xff]  }
  0x75   :  { %1048 = vmatprep.mubr.bf16.mxu1 %v2630_v48  ;;  %648 = vmatpush1.bf16.msra.mxu0 %v2633_v49  ;;  %v2720_v47 = vld [vmem:[%s3263_s5 + $0x28] sm:$0xff]  }
  0x76   :  { %1114 = vmatpush1.bf16.msra.mxu1 %v2633_v49  ;;  %649 = vmatprep.subr.bf16.mxu0 %v2644_v50  ;;  %v2721_v48 = vld [vmem:[%s3262_s4 + $0x28] sm:$0xff]   ;;  %v2722_v49 = vld [vmem:[%s3263_s5 + $0x70] sm:$0xff]  }
  0x77   :  { %1115 = vmatprep.subr.bf16.mxu1 %v2644_v50  ;;  %v2723_v50 = vld [vmem:[%s3262_s4 + $0x70] sm:$0xff]  }
  0x79   :  { %650 = vmatpush1.bf16.msra.mxu0 %v2642_v53 }
  0x7a   :  { %1116 = vmatpush1.bf16.msra.mxu1 %v2642_v53  ;;  %651 = vmatprep.subr.bf16.mxu0 %v2653_v54  ;;  %v2724_v53 = vld [vmem:[%s3263_s5 + $0x30] sm:$0xff]  }
  0x7b   :  { %1117 = vmatprep.subr.bf16.mxu1 %v2653_v54  ;;  %583 = vmatmul.mubr.bf16.gmra.mrb[8].mxu0 %v2632_v51  ;;  %v2688_v51 = vld [vmem:[%s3258_s0 + $0x50] ss:$12 sps:$4 sm:$0xff]  }
  0x7c   :  { %1049 = vmatmul.mubr.bf16.gmra.mrb[8].mxu1 %v2636_v52  ;;  %592 = vmatprep.mubr.bf16.mxu0 %v2637_v55  ;;  %v2689_v52 = vld [vmem:[#allocation3 + $0x50] ss:$12 sps:$4 sm:$0xff]  }
  0x7d   :  { %1058 = vmatprep.mubr.bf16.mxu1 %v2639_v56  ;;  %652 = vmatpush1.bf16.msra.mxu0 %v2651_v57  ;;  %v2725_v54 = vld [vmem:[%s3262_s4 + $0x30] sm:$0xff]  }
  0x7e   :  { %1118 = vmatpush1.bf16.msra.mxu1 %v2651_v57  ;;  %653 = vmatprep.subr.bf16.mxu0 %v2662_v58  ;;  %v2690_v55 = vld [vmem:[%s3258_s0 + $0x68] ss:$12 sps:$4 sm:$0xff]   ;;  %v2692_v57 = vld [vmem:[%s3258_s0 + $0x80] ss:$12 sps:$4 sm:$0xff]  }
  0x7f   :  { %1119 = vmatprep.subr.bf16.mxu1 %v2662_v58  ;;  %v2691_v56 = vld [vmem:[#allocation3 + $0x68] ss:$12 sps:$4 sm:$0xff]   ;;  %v2693_v58 = vld [vmem:[#allocation3 + $0x80] ss:$12 sps:$4 sm:$0xff]  }
  0x81   :  { %654 = vmatpush1.bf16.msra.mxu0 %v2660_v61 }
  0x82   :  { %1120 = vmatpush1.bf16.msra.mxu1 %v2660_v61  ;;  %655 = vmatprep.subr.bf16.mxu0 %v2671_v62  ;;  %v2696_v61 = vld [vmem:[%s3258_s0 + $0xb0] ss:$12 sps:$4 sm:$0xff]  }
  0x83   :  { %1121 = vmatprep.subr.bf16.mxu1 %v2671_v62  ;;  %593 = vmatmul.mubr.bf16.gmra.mrb[12].mxu0 %v2641_v59  ;;  %v2694_v59 = vld [vmem:[%s3258_s0 + $0x98] ss:$12 sps:$4 sm:$0xff]   ;;  %v2697_v62 = vld [vmem:[#allocation3 + $0xb0] ss:$12 sps:$4 sm:$0xff]  }
  0x84   :  { %1059 = vmatmul.mubr.bf16.gmra.mrb[12].mxu1 %v2645_v60  ;;  %602 = vmatprep.mubr.bf16.mxu0 %v2646_v63  ;;  %v2695_v60 = vld [vmem:[#allocation3 + $0x98] ss:$12 sps:$4 sm:$0xff]  }
  0x85   :  { %1068 = vmatprep.mubr.bf16.mxu1 %v2648_v0  ;;  %656 = vmatpush1.bf16.msra.mxu0 %v2669_v2  ;;  %v2726_v63 = vld [vmem:[%s3263_s5 + $0x78] sm:$0xff]  }
  0x86   :  { %1122 = vmatpush1.bf16.msra.mxu1 %v2669_v2  ;;  %657 = vmatprep.subr.bf16.mxu0 %v2680_v3  ;;  %v2727_v0 = vld [vmem:[%s3262_s4 + $0x78] sm:$0xff]  }
  0x87   :  { %1123 = vmatprep.subr.bf16.mxu1 %v2680_v3  ;;  %v2728_v2 = vld [vmem:[%s3263_s5 + $0x38] sm:$0xff]   ;;  %v3089_v3 = vld [vmem:[%s3265_s7] sm:$0xff]  }
  0x89   :  { %658 = vmatpush1.bf16.msra.mxu0 %v2678_v4 }
  0x8a   :  { %1124 = vmatpush1.bf16.msra.mxu1 %v2678_v4  ;;  %2236 = vmatprep.subr.bf16.mxu0 %v2698_v7  ;;  %v152_v4 = vlaneseq  ;;  %v118_v7 = vld [vmem:[%s3261_s3] sm:$0x3] }
  0x8b   :  { %2300 = vmatprep.subr.bf16.mxu1 %v2699_v8  ;;  %603 = vmatmul.mubr.bf16.gmra.mrb[16].mxu0 %v2650_v5 }
  0x8c   :  { %1069 = vmatmul.mubr.bf16.gmra.mrb[16].mxu1 %v2654_v6  ;;  %612 = vmatprep.mubr.bf16.mxu0 %v2655_v9  ;;  %v3092_v5 = vshrl.u32 %v152_v4, 7 }
  0x8d   :  { %1078 = vmatprep.mubr.bf16.mxu1 %v2657_v10 }
  0x8e   :  { %v154_v6 = vsub.s32 0, %v3092_v5  ;;  %v158_v8 = vsub.s32 1, %v3092_v5 }
  0x90   :  { %v3101_v9 = vrot.slane %v118_v7, %v154_v6  ;;  %v3103_v10 = vrot.slane %v118_v7, %v158_v8 }
  0x93   :  { %613 = vmatmul.mubr.bf16.gmra.mrb[20].mxu0 %v2659_v11 }
  0x94   :  { %1079 = vmatmul.mubr.bf16.gmra.mrb[20].mxu1 %v2663_v12  ;;  %622 = vmatprep.mubr.bf16.mxu0 %v2664_v13 }
  0x95   :  { %1088 = vmatprep.mubr.bf16.mxu1 %v2666_v14 }
  0x9b   :  { %623 = vmatmul.mubr.bf16.gmra.mrb[24].mxu0 %v2668_v15 }
  0x9c   :  { %1089 = vmatmul.mubr.bf16.gmra.mrb[24].mxu1 %v2672_v16  ;;  %632 = vmatprep.mubr.bf16.mxu0 %v2673_v17 }
  0x9d   :  { %1098 = vmatprep.mubr.bf16.mxu1 %v2675_v18 }
  0xa3   :  { %633 = vmatmul.mubr.bf16.gmra.mrb[28].mxu0 %v2677_v19 }
  0xa4   :  { %1099 = vmatmul.mubr.bf16.gmra.mrb[28].mxu1 %v2681_v20  ;;  %675 = vmatprep.mubr.bf16.mxu0 %v2810_v1 }
  0xa5   :  { %1141 = vmatprep.mubr.bf16.mxu1 %v2810_v1 }
  0xab   :  { %676 = vmatmul.mubr.bf16.vlgmr.msra.gmra.mrb[0].mxu0 %v2682_v21 }
  0xac   :  { %1142 = vmatmul.mubr.bf16.vlgmr.msra.gmra.mrb[0].mxu1 %v2683_v22  ;;  %685 = vmatprep.mubr.bf16.mxu0 %v2810_v1 }
  0xad   :  { %1151 = vmatprep.mubr.bf16.mxu1 %v2810_v1  ;;  %2237 = vmatpush3.bf16.msra.mxu0 %v2700_v23 }
  0xae   :  { %2301 = vmatpush3.bf16.msra.mxu1 %v2701_v24  ;;  %2238 = vmatprep.subr.bf16.mxu0 %v2702_v25 }
  0xaf   :  { %2302 = vmatprep.subr.bf16.mxu1 %v2703_v26 }
  0xb1   :  { %2239 = vmatpush3.bf16.msra.mxu0 %v2704_v27 }
  0xb2   :  { %2303 = vmatpush3.bf16.msra.mxu1 %v2705_v28  ;;  %2240 = vmatprep.subr.bf16.mxu0 %v2706_v29 }
  0xb3   :  { %2304 = vmatprep.subr.bf16.mxu1 %v2707_v30  ;;  %686 = vmatmul.mubr.bf16.gmra.mrb[4].mxu0 %v2684_v31 }
  0xb4   :  { %1152 = vmatmul.mubr.bf16.gmra.mrb[4].mxu1 %v2685_v32  ;;  %695 = vmatprep.mubr.bf16.mxu0 %v2810_v1 }
  0xb5   :  { %1161 = vmatprep.mubr.bf16.mxu1 %v2810_v1  ;;  %2241 = vmatpush3.bf16.msra.mxu0 %v2708_v33 }
  0xb6   :  { %2305 = vmatpush3.bf16.msra.mxu1 %v2709_v34  ;;  %2242 = vmatprep.subr.bf16.mxu0 %v2710_v35 }
  0xb7   :  { %2306 = vmatprep.subr.bf16.mxu1 %v2711_v36 }
  0xb9   :  { %2243 = vmatpush3.bf16.msra.mxu0 %v2712_v37 }
  0xba   :  { %2307 = vmatpush3.bf16.msra.mxu1 %v2713_v38  ;;  %2244 = vmatprep.subr.bf16.mxu0 %v2714_v39 }
  0xbb   :  { %2308 = vmatprep.subr.bf16.mxu1 %v2715_v40  ;;  %696 = vmatmul.mubr.bf16.gmra.mrb[8].mxu0 %v2686_v41 }
  0xbc   :  { %1162 = vmatmul.mubr.bf16.gmra.mrb[8].mxu1 %v2687_v42  ;;  %705 = vmatprep.mubr.bf16.mxu0 %v2810_v1 }
  0xbd   :  { %1171 = vmatprep.mubr.bf16.mxu1 %v2810_v1  ;;  %2245 = vmatpush3.bf16.msra.mxu0 %v2716_v43 }
  0xbe   :  { %2309 = vmatpush3.bf16.msra.mxu1 %v2717_v44  ;;  %2246 = vmatprep.subr.bf16.mxu0 %v2718_v45 }
  0xbf   :  { %2310 = vmatprep.subr.bf16.mxu1 %v2719_v46 }
  0xc1   :  { %2247 = vmatpush3.bf16.msra.mxu0 %v2720_v47 }
  0xc2   :  { %2311 = vmatpush3.bf16.msra.mxu1 %v2721_v48  ;;  %2248 = vmatprep.subr.bf16.mxu0 %v2722_v49 }
  0xc3   :  { %2312 = vmatprep.subr.bf16.mxu1 %v2723_v50  ;;  %706 = vmatmul.mubr.bf16.gmra.mrb[12].mxu0 %v2688_v51 }
  0xc4   :  { %1172 = vmatmul.mubr.bf16.gmra.mrb[12].mxu1 %v2689_v52  ;;  %715 = vmatprep.mubr.bf16.mxu0 %v2810_v1 }
  0xc5   :  { %1181 = vmatprep.mubr.bf16.mxu1 %v2810_v1  ;;  %2249 = vmatpush3.bf16.msra.mxu0 %v2724_v53 }
  0xc6   :  { %2313 = vmatpush3.bf16.msra.mxu1 %v2725_v54  ;;  %2250 = vmatprep.subr.bf16.mxu0 %v2726_v63  ;;  %v2731_v63 = vld [vmem:[%s3265_s7 + $0x8] sm:$0xff]  }
  0xc7   :  { %2314 = vmatprep.subr.bf16.mxu1 %v2727_v0 }
  0xc9   :  { %2251 = vmatpush3.bf16.msra.mxu0 %v2728_v2 }
  0xca   :  { %2383 = vmatprep.subr.bf16.mxu0 %v3089_v3 }
  0xcb   :  { %716 = vmatmul.mubr.bf16.gmra.mrb[16].mxu0 %v2690_v55 }
  0xcc   :  { %1182 = vmatmul.mubr.bf16.gmra.mrb[16].mxu1 %v2691_v56  ;;  %725 = vmatprep.mubr.bf16.mxu0 %v2810_v1 }
  0xcd   :  { %1191 = vmatprep.mubr.bf16.mxu1 %v2810_v1 }
  0xd3   :  { %726 = vmatmul.mubr.bf16.gmra.mrb[20].mxu0 %v2692_v57 }
  0xd4   :  { %1192 = vmatmul.mubr.bf16.gmra.mrb[20].mxu1 %v2693_v58  ;;  %735 = vmatprep.mubr.bf16.mxu0 %v2810_v1 }
  0xd5   :  { %1201 = vmatprep.mubr.bf16.mxu1 %v2810_v1 }
  0xdb   :  { %736 = vmatmul.mubr.bf16.gmra.mrb[24].mxu0 %v2694_v59 }
  0xdc   :  { %1202 = vmatmul.mubr.bf16.gmra.mrb[24].mxu1 %v2695_v60  ;;  %745 = vmatprep.mubr.bf16.mxu0 %v2810_v1 }
  0xdd   :  { %1211 = vmatprep.mubr.bf16.mxu1 %v2810_v1  ;;  %v2729_v1 = vld [vmem:[%s3262_s4 + $0x38] sm:$0xff]  }
  0xde   :  { %2315 = vmatpush3.bf16.msra.mxu1 %v2729_v1 }
  0xe3   :  { %746 = vmatmul.mubr.bf16.gmra.mrb[28].mxu0 %v2696_v61 }
  0xe4   :  { %1212 = vmatmul.mubr.bf16.gmra.mrb[28].mxu1 %v2697_v62 }
 0x17e   :  { %v677_v11 = vpop.f32.mrb[0].mxu0 }
 0x17f   :  { %v1143_v12 = vpop.f32.mrb[0].mxu1  ;;  %v2423_v13 = vadd.f32 %v677_v11, %v3101_v9  ;;  %v679_v15 = vpop.f32.mrb[1].mxu0 }
 0x180   :  { %v2455_v14 = vadd.f32 %v1143_v12, %v3101_v9  ;;  %v1145_v16 = vpop.f32.mrb[1].mxu1  ;;  %v2424_v17 = vadd.f32 %v679_v15, %v3103_v10  ;;  %v681_v19 = vpop.f32.mrb[2].mxu0 }
 0x181   :  { %v2456_v18 = vadd.f32 %v1145_v16, %v3103_v10  ;;  %v1147_v20 = vpop.f32.mrb[2].mxu1  ;;  %v756_v21 = vmax.f32 %v2423_v13, 0.0  ;;  %v2425_v23 = vadd.f32 %v681_v19, %v3101_v9  ;;  %v683_v25 = vpop.f32.mrb[3].mxu0 }
 0x182   :  { %v1222_v22 = vmax.f32 %v2455_v14, 0.0  ;;  %v2457_v24 = vadd.f32 %v1147_v20, %v3101_v9  ;;  %v1149_v26 = vpop.f32.mrb[3].mxu1  ;;  %v757_v27 = vmax.f32 %v2424_v17, 0.0  ;;  %v2426_v29 = vadd.f32 %v683_v25, %v3103_v10 }
 0x183   :  { %v1223_v28 = vmax.f32 %v2456_v18, 0.0  ;;  %v2458_v30 = vadd.f32 %v1149_v26, %v3103_v10  ;;  %v758_v31 = vmax.f32 %v2425_v23, 0.0  ;;  %v788_v35 = vmin.f32 %v756_v21, 1.0 }
 0x184   :  { %v1224_v32 = vmax.f32 %v2457_v24, 0.0  ;;  %v759_v33 = vmax.f32 %v2426_v29, 0.0  ;;  %v1254_v36 = vmin.f32 %v1222_v22, 1.0  ;;  %v789_v39 = vmin.f32 %v757_v27, 1.0 }
 0x185   :  { %v1225_v34 = vmax.f32 %v2458_v30, 0.0  ;;  %v790_v37 = vmin.f32 %v758_v31, 1.0  ;;  %v1255_v40 = vmin.f32 %v1223_v28, 1.0 }
 0x186   :  { %v1256_v38 = vmin.f32 %v1224_v32, 1.0  ;;  %v791_v41 = vmin.f32 %v759_v33, 1.0  ;;  %v687_v43 = vpop.f32.mrb[4].mxu0 }
 0x187   :  { %v1257_v42 = vmin.f32 %v1225_v34, 1.0  ;;  %v1153_v44 = vpop.f32.mrb[4].mxu1  ;;  %v820_v45 = vpack.c.bf16 %v790_v37, %v788_v35  ;;  %v2427_v47 = vadd.f32 %v687_v43, %v3101_v9  ;;  %v689_v49 = vpop.f32.mrb[5].mxu0 }
 0x188   :  { %v1286_v46 = vpack.c.bf16 %v1256_v38, %v1254_v36  ;;  %v2459_v48 = vadd.f32 %v1153_v44, %v3101_v9  ;;  %v1155_v50 = vpop.f32.mrb[5].mxu1  ;;  %v821_v51 = vpack.c.bf16 %v791_v41, %v789_v39  ;;  %v2428_v53 = vadd.f32 %v689_v49, %v3103_v10  ;;  %v691_v55 = vpop.f32.mrb[6].mxu0 }
 0x189   :  { %v1287_v52 = vpack.c.bf16 %v1257_v42, %v1255_v40  ;;  %v2460_v54 = vadd.f32 %v1155_v50, %v3103_v10  ;;  %v1157_v56 = vpop.f32.mrb[6].mxu1  ;;  %v760_v57 = vmax.f32 %v2427_v47, 0.0  ;;  %v2429_v59 = vadd.f32 %v691_v55, %v3101_v9  ;;  %v693_v61 = vpop.f32.mrb[7].mxu0 }
 0x18a   :  { %v1226_v58 = vmax.f32 %v2459_v48, 0.0  ;;  %v2461_v60 = vadd.f32 %v1157_v56, %v3101_v9  ;;  %v1159_v62 = vpop.f32.mrb[7].mxu1  ;;  %v761_v0 = vmax.f32 %v2428_v53, 0.0  ;;  %v2430_v1 = vadd.f32 %v693_v61, %v3103_v10  ;;  %1687 = vmatprep.mubr.bf16.mxu1 %v821_v51 }
 0x18b   :  { %v1227_v2 = vmax.f32 %v2460_v54, 0.0  ;;  %v2462_v4 = vadd.f32 %v1159_v62, %v3103_v10  ;;  %1494 = vmatprep.mubr.bf16.mxu0 %v1287_v52  ;;  %v762_v7 = vmax.f32 %v2429_v59, 0.0  ;;  %1688 = vmatmul.mubr.bf16.vlgmr.msra.gmra.mrb[32].mxu1 %v820_v45  ;;  %v792_v13 = vmin.f32 %v760_v57, 1.0 }
 0x18c   :  { %v1228_v8 = vmax.f32 %v2461_v60, 0.0  ;;  %1495 = vmatmul.mubr.bf16.vlgmr.msra.gmra.mrb[32].mxu0 %v1286_v46  ;;  %v763_v11 = vmax.f32 %v2430_v1, 0.0  ;;  %v1258_v14 = vmin.f32 %v1226_v58, 1.0  ;;  %v793_v17 = vmin.f32 %v761_v0, 1.0 }
 0x18d   :  { %v1229_v12 = vmax.f32 %v2462_v4, 0.0  ;;  %2384 = vmatpush3.bf16.msra.mxu0 %v3089_v3  ;;  %v794_v15 = vmin.f32 %v762_v7, 1.0  ;;  %v1259_v18 = vmin.f32 %v1227_v2, 1.0 }
 0x18e   :  { %v1260_v16 = vmin.f32 %v1228_v8, 1.0  ;;  %2385 = vmatprep.subr.bf16.mxu0 %v2731_v63  ;;  %v795_v19 = vmin.f32 %v763_v11, 1.0  ;;  %v697_v21 = vpop.f32.mrb[8].mxu0 }
 0x18f   :  { %v1261_v20 = vmin.f32 %v1229_v12, 1.0  ;;  %v1163_v22 = vpop.f32.mrb[8].mxu1  ;;  %v822_v23 = vpack.c.bf16 %v794_v15, %v792_v13  ;;  %v2431_v25 = vadd.f32 %v697_v21, %v3101_v9  ;;  %v699_v27 = vpop.f32.mrb[9].mxu0 }
 0x190   :  { %v1288_v24 = vpack.c.bf16 %v1260_v16, %v1258_v14  ;;  %v2463_v26 = vadd.f32 %v1163_v22, %v3101_v9  ;;  %v1165_v28 = vpop.f32.mrb[9].mxu1  ;;  %v823_v3 = vpack.c.bf16 %v795_v19, %v793_v17  ;;  %v2432_v30 = vadd.f32 %v699_v27, %v3103_v10  ;;  %v701_v32 = vpop.f32.mrb[10].mxu0 }
 0x191   :  { %v1289_v29 = vpack.c.bf16 %v1261_v20, %v1259_v18  ;;  %v2464_v31 = vadd.f32 %v1165_v28, %v3103_v10  ;;  %v1167_v33 = vpop.f32.mrb[10].mxu1  ;;  %2386 = vmatpush3.bf16.msra.mxu0 %v2731_v63  ;;  %v764_v34 = vmax.f32 %v2431_v25, 0.0  ;;  %v2433_v36 = vadd.f32 %v701_v32, %v3101_v9  ;;  %v703_v38 = vpop.f32.mrb[11].mxu0 }
 0x192   :  { %v1230_v35 = vmax.f32 %v2463_v26, 0.0  ;;  %v2465_v37 = vadd.f32 %v1167_v33, %v3101_v9  ;;  %v1169_v39 = vpop.f32.mrb[11].mxu1  ;;  %v765_v40 = vmax.f32 %v2432_v30, 0.0  ;;  %v2434_v42 = vadd.f32 %v703_v38, %v3103_v10  ;;  %1695 = vmatprep.mubr.bf16.mxu1 %v823_v3 }
 0x193   :  { %v1231_v41 = vmax.f32 %v2464_v31, 0.0  ;;  %v2466_v43 = vadd.f32 %v1169_v39, %v3103_v10  ;;  %1502 = vmatprep.mubr.bf16.mxu0 %v1289_v29  ;;  %v766_v44 = vmax.f32 %v2433_v36, 0.0  ;;  %1696 = vmatmul.mubr.bf16.gmra.mrb[36].mxu1 %v822_v23  ;;  %v796_v48 = vmin.f32 %v764_v34, 1.0 }
 0x194   :  { %v1232_v45 = vmax.f32 %v2465_v37, 0.0  ;;  %1503 = vmatmul.mubr.bf16.gmra.mrb[36].mxu0 %v1288_v24  ;;  %v767_v46 = vmax.f32 %v2434_v42, 0.0  ;;  %v1262_v49 = vmin.f32 %v1230_v35, 1.0  ;;  %v797_v52 = vmin.f32 %v765_v40, 1.0 }
 0x195   :  { %v1233_v47 = vmax.f32 %v2466_v43, 0.0  ;;  %v798_v50 = vmin.f32 %v766_v44, 1.0  ;;  %v1263_v53 = vmin.f32 %v1231_v41, 1.0 }
 0x196   :  { %v1264_v51 = vmin.f32 %v1232_v45, 1.0  ;;  %v799_v54 = vmin.f32 %v767_v46, 1.0  ;;  %v707_v56 = vpop.f32.mrb[12].mxu0 }
 0x197   :  { %v1265_v55 = vmin.f32 %v1233_v47, 1.0  ;;  %v1173_v57 = vpop.f32.mrb[12].mxu1  ;;  %v824_v58 = vpack.c.bf16 %v798_v50, %v796_v48  ;;  %v2435_v60 = vadd.f32 %v707_v56, %v3101_v9  ;;  %v709_v62 = vpop.f32.mrb[13].mxu0 }
 0x198   :  { %v1290_v59 = vpack.c.bf16 %v1264_v51, %v1262_v49  ;;  %v2467_v61 = vadd.f32 %v1173_v57, %v3101_v9  ;;  %v1175_v63 = vpop.f32.mrb[13].mxu1  ;;  %v825_v0 = vpack.c.bf16 %v799_v54, %v797_v52  ;;  %v2436_v1 = vadd.f32 %v709_v62, %v3103_v10  ;;  %v711_v7 = vpop.f32.mrb[14].mxu0 }
 0x199   :  { %v1291_v2 = vpack.c.bf16 %v1265_v55, %v1263_v53  ;;  %v2468_v4 = vadd.f32 %v1175_v63, %v3103_v10  ;;  %v1177_v8 = vpop.f32.mrb[14].mxu1  ;;  %v768_v11 = vmax.f32 %v2435_v60, 0.0  ;;  %v2437_v13 = vadd.f32 %v711_v7, %v3101_v9  ;;  %v713_v15 = vpop.f32.mrb[15].mxu0 }
 0x19a   :  { %v1234_v12 = vmax.f32 %v2467_v61, 0.0  ;;  %v2469_v14 = vadd.f32 %v1177_v8, %v3101_v9  ;;  %v1179_v16 = vpop.f32.mrb[15].mxu1  ;;  %v769_v17 = vmax.f32 %v2436_v1, 0.0  ;;  %v2438_v19 = vadd.f32 %v713_v15, %v3103_v10  ;;  %1703 = vmatprep.mubr.bf16.mxu1 %v825_v0 }
 0x19b   :  { %v1235_v18 = vmax.f32 %v2468_v4, 0.0  ;;  %v2470_v20 = vadd.f32 %v1179_v16, %v3103_v10  ;;  %1510 = vmatprep.mubr.bf16.mxu0 %v1291_v2  ;;  %v770_v21 = vmax.f32 %v2437_v13, 0.0  ;;  %1704 = vmatmul.mubr.bf16.gmra.mrb[40].mxu1 %v824_v58  ;;  %v800_v25 = vmin.f32 %v768_v11, 1.0 }
 0x19c   :  { %v1236_v22 = vmax.f32 %v2469_v14, 0.0  ;;  %1511 = vmatmul.mubr.bf16.gmra.mrb[40].mxu0 %v1290_v59  ;;  %v771_v23 = vmax.f32 %v2438_v19, 0.0  ;;  %v1266_v26 = vmin.f32 %v1234_v12, 1.0  ;;  %v801_v3 = vmin.f32 %v769_v17, 1.0 }
 0x19d   :  { %v1237_v24 = vmax.f32 %v2470_v20, 0.0  ;;  %v802_v27 = vmin.f32 %v770_v21, 1.0  ;;  %v1267_v29 = vmin.f32 %v1235_v18, 1.0 }
 0x19e   :  { %v1268_v28 = vmin.f32 %v1236_v22, 1.0  ;;  %v803_v30 = vmin.f32 %v771_v23, 1.0  ;;  %v717_v32 = vpop.f32.mrb[16].mxu0 }
 0x19f   :  { %v1269_v31 = vmin.f32 %v1237_v24, 1.0  ;;  %v1183_v33 = vpop.f32.mrb[16].mxu1  ;;  %v826_v34 = vpack.c.bf16 %v802_v27, %v800_v25  ;;  %v2439_v36 = vadd.f32 %v717_v32, %v3101_v9  ;;  %v719_v38 = vpop.f32.mrb[17].mxu0 }
 0x1a0   :  { %v1292_v35 = vpack.c.bf16 %v1268_v28, %v1266_v26  ;;  %v2471_v37 = vadd.f32 %v1183_v33, %v3101_v9  ;;  %v1185_v39 = vpop.f32.mrb[17].mxu1  ;;  %v827_v40 = vpack.c.bf16 %v803_v30, %v801_v3  ;;  %v2440_v42 = vadd.f32 %v719_v38, %v3103_v10  ;;  %v721_v44 = vpop.f32.mrb[18].mxu0 }
 0x1a1   :  { %v1293_v41 = vpack.c.bf16 %v1269_v31, %v1267_v29  ;;  %v2472_v43 = vadd.f32 %v1185_v39, %v3103_v10  ;;  %v1187_v45 = vpop.f32.mrb[18].mxu1  ;;  %v772_v46 = vmax.f32 %v2439_v36, 0.0  ;;  %v2441_v48 = vadd.f32 %v721_v44, %v3101_v9  ;;  %v723_v50 = vpop.f32.mrb[19].mxu0 }
 0x1a2   :  { %v1238_v47 = vmax.f32 %v2471_v37, 0.0  ;;  %v2473_v49 = vadd.f32 %v1187_v45, %v3101_v9  ;;  %v1189_v51 = vpop.f32.mrb[19].mxu1  ;;  %v773_v52 = vmax.f32 %v2440_v42, 0.0  ;;  %v2442_v54 = vadd.f32 %v723_v50, %v3103_v10  ;;  %1711 = vmatprep.mubr.bf16.mxu1 %v827_v40 }
 0x1a3   :  { %v1239_v53 = vmax.f32 %v2472_v43, 0.0  ;;  %v2474_v55 = vadd.f32 %v1189_v51, %v3103_v10  ;;  %1518 = vmatprep.mubr.bf16.mxu0 %v1293_v41  ;;  %v774_v56 = vmax.f32 %v2441_v48, 0.0  ;;  %1712 = vmatmul.mubr.bf16.gmra.mrb[44].mxu1 %v826_v34  ;;  %v804_v60 = vmin.f32 %v772_v46, 1.0 }
 0x1a4   :  { %v1240_v57 = vmax.f32 %v2473_v49, 0.0  ;;  %1519 = vmatmul.mubr.bf16.gmra.mrb[44].mxu0 %v1292_v35  ;;  %v775_v58 = vmax.f32 %v2442_v54, 0.0  ;;  %v1270_v61 = vmin.f32 %v1238_v47, 1.0  ;;  %v805_v0 = vmin.f32 %v773_v52, 1.0 }
 0x1a5   :  { %v1241_v59 = vmax.f32 %v2474_v55, 0.0  ;;  %v806_v62 = vmin.f32 %v774_v56, 1.0  ;;  %v1271_v2 = vmin.f32 %v1239_v53, 1.0 }
 0x1a6   :  { %v1272_v63 = vmin.f32 %v1240_v57, 1.0  ;;  %v807_v1 = vmin.f32 %v775_v58, 1.0  ;;  %v727_v7 = vpop.f32.mrb[20].mxu0 }
 0x1a7   :  { %v1273_v4 = vmin.f32 %v1241_v59, 1.0  ;;  %v1193_v8 = vpop.f32.mrb[20].mxu1  ;;  %v828_v11 = vpack.c.bf16 %v806_v62, %v804_v60  ;;  %v2443_v13 = vadd.f32 %v727_v7, %v3101_v9  ;;  %v729_v15 = vpop.f32.mrb[21].mxu0 }
 0x1a8   :  { %v1294_v12 = vpack.c.bf16 %v1272_v63, %v1270_v61  ;;  %v2475_v14 = vadd.f32 %v1193_v8, %v3101_v9  ;;  %v1195_v16 = vpop.f32.mrb[21].mxu1  ;;  %v829_v17 = vpack.c.bf16 %v807_v1, %v805_v0  ;;  %v2444_v19 = vadd.f32 %v729_v15, %v3103_v10  ;;  %v731_v21 = vpop.f32.mrb[22].mxu0 }
 0x1a9   :  { %v1295_v18 = vpack.c.bf16 %v1273_v4, %v1271_v2  ;;  %v2476_v20 = vadd.f32 %v1195_v16, %v3103_v10  ;;  %v1197_v22 = vpop.f32.mrb[22].mxu1  ;;  %v776_v23 = vmax.f32 %v2443_v13, 0.0  ;;  %v2445_v25 = vadd.f32 %v731_v21, %v3101_v9  ;;  %v733_v27 = vpop.f32.mrb[23].mxu0 }
 0x1aa   :  { %v1242_v24 = vmax.f32 %v2475_v14, 0.0  ;;  %v2477_v26 = vadd.f32 %v1197_v22, %v3101_v9  ;;  %v1199_v28 = vpop.f32.mrb[23].mxu1  ;;  %v777_v3 = vmax.f32 %v2444_v19, 0.0  ;;  %v2446_v30 = vadd.f32 %v733_v27, %v3103_v10  ;;  %1719 = vmatprep.mubr.bf16.mxu1 %v829_v17 }
 0x1ab   :  { %v1243_v29 = vmax.f32 %v2476_v20, 0.0  ;;  %v2478_v31 = vadd.f32 %v1199_v28, %v3103_v10  ;;  %1526 = vmatprep.mubr.bf16.mxu0 %v1295_v18  ;;  %v778_v32 = vmax.f32 %v2445_v25, 0.0  ;;  %1720 = vmatmul.mubr.bf16.gmra.mrb[48].mxu1 %v828_v11  ;;  %v808_v36 = vmin.f32 %v776_v23, 1.0 }
 0x1ac   :  { %v1244_v33 = vmax.f32 %v2477_v26, 0.0  ;;  %1527 = vmatmul.mubr.bf16.gmra.mrb[48].mxu0 %v1294_v12  ;;  %v779_v34 = vmax.f32 %v2446_v30, 0.0  ;;  %v1274_v37 = vmin.f32 %v1242_v24, 1.0  ;;  %v809_v40 = vmin.f32 %v777_v3, 1.0 }
 0x1ad   :  { %v1245_v35 = vmax.f32 %v2478_v31, 0.0  ;;  %v810_v38 = vmin.f32 %v778_v32, 1.0  ;;  %v1275_v41 = vmin.f32 %v1243_v29, 1.0 }
 0x1ae   :  { %v1276_v39 = vmin.f32 %v1244_v33, 1.0  ;;  %v811_v42 = vmin.f32 %v779_v34, 1.0  ;;  %v737_v44 = vpop.f32.mrb[24].mxu0 }
 0x1af   :  { %v1277_v43 = vmin.f32 %v1245_v35, 1.0  ;;  %v1203_v45 = vpop.f32.mrb[24].mxu1  ;;  %v830_v46 = vpack.c.bf16 %v810_v38, %v808_v36  ;;  %v2447_v48 = vadd.f32 %v737_v44, %v3101_v9  ;;  %v739_v50 = vpop.f32.mrb[25].mxu0 }
 0x1b0   :  { %v1296_v47 = vpack.c.bf16 %v1276_v39, %v1274_v37  ;;  %v2479_v49 = vadd.f32 %v1203_v45, %v3101_v9  ;;  %v1205_v51 = vpop.f32.mrb[25].mxu1  ;;  %v831_v52 = vpack.c.bf16 %v811_v42, %v809_v40  ;;  %v2448_v54 = vadd.f32 %v739_v50, %v3103_v10  ;;  %v741_v56 = vpop.f32.mrb[26].mxu0 }
 0x1b1   :  { %v1297_v53 = vpack.c.bf16 %v1277_v43, %v1275_v41  ;;  %v2480_v55 = vadd.f32 %v1205_v51, %v3103_v10  ;;  %v1207_v57 = vpop.f32.mrb[26].mxu1  ;;  %v780_v58 = vmax.f32 %v2447_v48, 0.0  ;;  %v2449_v60 = vadd.f32 %v741_v56, %v3101_v9  ;;  %v743_v62 = vpop.f32.mrb[27].mxu0 }
 0x1b2   :  { %v1246_v59 = vmax.f32 %v2479_v49, 0.0  ;;  %v2481_v61 = vadd.f32 %v1207_v57, %v3101_v9  ;;  %v1209_v63 = vpop.f32.mrb[27].mxu1  ;;  %v781_v0 = vmax.f32 %v2448_v54, 0.0  ;;  %v2450_v1 = vadd.f32 %v743_v62, %v3103_v10  ;;  %1727 = vmatprep.mubr.bf16.mxu1 %v831_v52 }
 0x1b3   :  { %v1247_v2 = vmax.f32 %v2480_v55, 0.0  ;;  %v2482_v4 = vadd.f32 %v1209_v63, %v3103_v10  ;;  %1534 = vmatprep.mubr.bf16.mxu0 %v1297_v53  ;;  %v782_v7 = vmax.f32 %v2449_v60, 0.0  ;;  %1728 = vmatmul.mubr.bf16.gmra.mrb[52].mxu1 %v830_v46  ;;  %v812_v13 = vmin.f32 %v780_v58, 1.0 }
 0x1b4   :  { %v1248_v8 = vmax.f32 %v2481_v61, 0.0  ;;  %1535 = vmatmul.mubr.bf16.gmra.mrb[52].mxu0 %v1296_v47  ;;  %v783_v11 = vmax.f32 %v2450_v1, 0.0  ;;  %v1278_v14 = vmin.f32 %v1246_v59, 1.0  ;;  %v813_v17 = vmin.f32 %v781_v0, 1.0  ;;  %v3176_v1 = vld [vmem:[%s3264_s6] ss:$0 sm:$0xff] }
 0x1b5   :  { %v1249_v12 = vmax.f32 %v2482_v4, 0.0  ;;  %v814_v15 = vmin.f32 %v782_v7, 1.0  ;;  %v1279_v18 = vmin.f32 %v1247_v2, 1.0 }
 0x1b6   :  { %v1280_v16 = vmin.f32 %v1248_v8, 1.0  ;;  %v815_v19 = vmin.f32 %v783_v11, 1.0  ;;  %v747_v21 = vpop.f32.mrb[28].mxu0 }
 0x1b7   :  { %v1281_v20 = vmin.f32 %v1249_v12, 1.0  ;;  %v1213_v22 = vpop.f32.mrb[28].mxu1  ;;  %v832_v23 = vpack.c.bf16 %v814_v15, %v812_v13  ;;  %v2451_v25 = vadd.f32 %v747_v21, %v3101_v9  ;;  %v749_v27 = vpop.f32.mrb[29].mxu0 }
 0x1b8   :  { %v1298_v24 = vpack.c.bf16 %v1280_v16, %v1278_v14  ;;  %v2483_v26 = vadd.f32 %v1213_v22, %v3101_v9  ;;  %v1215_v28 = vpop.f32.mrb[29].mxu1  ;;  %v833_v3 = vpack.c.bf16 %v815_v19, %v813_v17  ;;  %v2452_v30 = vadd.f32 %v749_v27, %v3103_v10  ;;  %v751_v32 = vpop.f32.mrb[30].mxu0 }
 0x1b9   :  { %v1299_v29 = vpack.c.bf16 %v1281_v20, %v1279_v18  ;;  %v2484_v31 = vadd.f32 %v1215_v28, %v3103_v10  ;;  %v1217_v33 = vpop.f32.mrb[30].mxu1  ;;  %v784_v34 = vmax.f32 %v2451_v25, 0.0  ;;  %v2453_v36 = vadd.f32 %v751_v32, %v3101_v9  ;;  %v753_v38 = vpop.f32.mrb[31].mxu0 }
 0x1ba   :  { %v1250_v35 = vmax.f32 %v2483_v26, 0.0  ;;  %v2485_v37 = vadd.f32 %v1217_v33, %v3101_v9  ;;  %v1219_v39 = vpop.f32.mrb[31].mxu1  ;;  %v785_v40 = vmax.f32 %v2452_v30, 0.0  ;;  %v2454_v42 = vadd.f32 %v753_v38, %v3103_v10  ;;  %1735 = vmatprep.mubr.bf16.mxu1 %v833_v3 }
 0x1bb   :  { %v1251_v41 = vmax.f32 %v2484_v31, 0.0  ;;  %v2486_v43 = vadd.f32 %v1219_v39, %v3103_v10  ;;  %1542 = vmatprep.mubr.bf16.mxu0 %v1299_v29  ;;  %v786_v44 = vmax.f32 %v2453_v36, 0.0  ;;  %1736 = vmatmul.mubr.bf16.gmra.mrb[56].mxu1 %v832_v23  ;;  %v816_v48 = vmin.f32 %v784_v34, 1.0 }
 0x1bc   :  { %v1252_v45 = vmax.f32 %v2485_v37, 0.0  ;;  %1543 = vmatmul.mubr.bf16.gmra.mrb[56].mxu0 %v1298_v24  ;;  %v787_v46 = vmax.f32 %v2454_v42, 0.0  ;;  %v1282_v49 = vmin.f32 %v1250_v35, 1.0  ;;  %v817_v51 = vmin.f32 %v785_v40, 1.0 }
 0x1bd   :  { %v1253_v47 = vmax.f32 %v2486_v43, 0.0  ;;  %v818_v50 = vmin.f32 %v786_v44, 1.0  ;;  %v1283_v52 = vmin.f32 %v1251_v41, 1.0 }
 0x1be   :  { %v1284_v9 = vmin.f32 %v1252_v45, 1.0  ;;  %v819_v53 = vmin.f32 %v787_v46, 1.0 }
 0x1bf   :  { %v1285_v54 = vmin.f32 %v1253_v47, 1.0  ;;  %v834_v55 = vpack.c.bf16 %v818_v50, %v816_v48 }
 0x1c0   :  { %v1300_v56 = vpack.c.bf16 %v1284_v9, %v1282_v49  ;;  %v835_v57 = vpack.c.bf16 %v819_v53, %v817_v51 }
 0x1c1   :  { %v1301_v10 = vpack.c.bf16 %v1285_v54, %v1283_v52 }
 0x1c2   :  { %1743 = vmatprep.mubr.bf16.mxu1 %v835_v57 }
 0x1c3   :  { %1550 = vmatprep.mubr.bf16.mxu0 %v1301_v10  ;;  %1744 = vmatmul.mubr.bf16.gmra.mrb[60].mxu1 %v834_v55 }
 0x1c4   :  { %1551 = vmatmul.mubr.bf16.gmra.mrb[60].mxu0 %v1300_v56 }
 0x25e   :  { %v2316_v59 = vpop.f32.mrb[32].mxu1 }
 0x25f   :  { %v2252_v58 = vpop.f32.mrb[32].mxu0  ;;  %v2317_v61 = vpop.f32.mrb[33].mxu1 }
 0x260   :  { %v2253_v60 = vpop.f32.mrb[33].mxu0  ;;  %v2318_v63 = vadd.f32 %v2317_v61, %v2316_v59  ;;  %v2319_v2 = vpop.f32.mrb[34].mxu1 }
 0x261   :  { %v2254_v62 = vadd.f32 %v2253_v60, %v2252_v58  ;;  %v2255_v0 = vpop.f32.mrb[34].mxu0  ;;  %v2320_v7 = vpop.f32.mrb[35].mxu1 }
 0x262   :  { %v2256_v4 = vpop.f32.mrb[35].mxu0  ;;  %v2321_v12 = vadd.f32 %v2320_v7, %v2319_v2 }
 0x263   :  { %v1690_v8 = vadd.f32 %v2318_v63, %v2254_v62  ;;  %v2257_v11 = vadd.f32 %v2256_v4, %v2255_v0 }
 0x265   :  { %v1759_v13 = vadd.f32 %v3176_v1, %v1690_v8  ;;  %v1693_v14 = vadd.f32 %v2321_v12, %v2257_v11 }
 0x266   :  { %v2322_v18 = vpop.f32.mrb[36].mxu1 }
 0x267   :  { %v1775_v15 = vmax.f32 %v1759_v13, 0.0  ;;  %v1760_v16 = vadd.f32 %v3176_v1, %v1693_v14  ;;  %v2258_v17 = vpop.f32.mrb[36].mxu0  ;;  %v2323_v20 = vpop.f32.mrb[37].mxu1 }
 0x268   :  { %v2259_v19 = vpop.f32.mrb[37].mxu0  ;;  %v2324_v23 = vadd.f32 %v2323_v20, %v2322_v18  ;;  %v2325_v25 = vpop.f32.mrb[38].mxu1 }
 0x269   :  { %v1776_v21 = vmax.f32 %v1760_v16, 0.0  ;;  %v2260_v22 = vadd.f32 %v2259_v19, %v2258_v17  ;;  %v2261_v24 = vpop.f32.mrb[38].mxu0  ;;  %v1791_v26 = vmin.f32 %v1775_v15, 1.0  ;;  %v2326_v28 = vpop.f32.mrb[39].mxu1 }
 0x26a   :  { %v2262_v27 = vpop.f32.mrb[39].mxu0  ;;  %v2327_v31 = vadd.f32 %v2326_v28, %v2325_v25 }
 0x26b   :  { %v1792_v3 = vmin.f32 %v1776_v21, 1.0  ;;  %v1698_v29 = vadd.f32 %v2324_v23, %v2260_v22  ;;  %v2263_v30 = vadd.f32 %v2262_v27, %v2261_v24 }
 0x26d   :  { %v1761_v32 = vadd.f32 %v3176_v1, %v1698_v29  ;;  %v1701_v33 = vadd.f32 %v2327_v31, %v2263_v30  ;;  %v1807_v34 = vpack.c.bf16 %v1792_v3, %v1791_v26 }
 0x26e   :  { %v2328_v38 = vpop.f32.mrb[40].mxu1 }
 0x26f   :  { %v1777_v35 = vmax.f32 %v1761_v32, 0.0  ;;  %v1762_v36 = vadd.f32 %v3176_v1, %v1701_v33  ;;  %v2264_v37 = vpop.f32.mrb[40].mxu0  ;;  %2387 = vmatprep.mubr.msk.bf16.mxu0 %vm1838_vm0, %v1807_v34  ;;  %v2329_v40 = vpop.f32.mrb[41].mxu1 }
 0x270   :  { %v2265_v39 = vpop.f32.mrb[41].mxu0  ;;  %v2330_v43 = vadd.f32 %v2329_v40, %v2328_v38  ;;  %v2331_v45 = vpop.f32.mrb[42].mxu1 }
 0x271   :  { %v1778_v41 = vmax.f32 %v1762_v36, 0.0  ;;  %v2266_v42 = vadd.f32 %v2265_v39, %v2264_v37  ;;  %v2267_v44 = vpop.f32.mrb[42].mxu0  ;;  %v1793_v46 = vmin.f32 %v1777_v35, 1.0  ;;  %v2332_v48 = vpop.f32.mrb[43].mxu1 }
 0x272   :  { %v2268_v47 = vpop.f32.mrb[43].mxu0  ;;  %v2333_v51 = vadd.f32 %v2332_v48, %v2331_v45 }
 0x273   :  { %v1794_v49 = vmin.f32 %v1778_v41, 1.0  ;;  %v1706_v50 = vadd.f32 %v2330_v43, %v2266_v42  ;;  %v2269_v9 = vadd.f32 %v2268_v47, %v2267_v44 }
 0x275   :  { %v1808_v52 = vpack.c.bf16 %v1794_v49, %v1793_v46  ;;  %v1763_v53 = vadd.f32 %v3176_v1, %v1706_v50  ;;  %v1709_v54 = vadd.f32 %v2333_v51, %v2269_v9 }
 0x276   :  { %v2334_v10 = vpop.f32.mrb[44].mxu1 }
 0x277   :  { %v1779_v55 = vmax.f32 %v1763_v53, 0.0  ;;  %v1764_v56 = vadd.f32 %v3176_v1, %v1709_v54  ;;  %v2270_v57 = vpop.f32.mrb[44].mxu0  ;;  %2388 = vmatmul.mubr.msk.bf16.vlgmr.msra.gmra.mrb[64].mxu0 %vm1838_vm0, %v1808_v52  ;;  %v2335_v59 = vpop.f32.mrb[45].mxu1 }
 0x278   :  { %v2271_v58 = vpop.f32.mrb[45].mxu0  ;;  %v2336_v62 = vadd.f32 %v2335_v59, %v2334_v10  ;;  %v2337_v0 = vpop.f32.mrb[46].mxu1 }
 0x279   :  { %v1780_v60 = vmax.f32 %v1764_v56, 0.0  ;;  %v2272_v61 = vadd.f32 %v2271_v58, %v2270_v57  ;;  %v2273_v63 = vpop.f32.mrb[46].mxu0  ;;  %v1795_v2 = vmin.f32 %v1779_v55, 1.0  ;;  %v2338_v7 = vpop.f32.mrb[47].mxu1 }
 0x27a   :  { %v2274_v4 = vpop.f32.mrb[47].mxu0  ;;  %v2339_v13 = vadd.f32 %v2338_v7, %v2337_v0 }
 0x27b   :  { %v1796_v8 = vmin.f32 %v1780_v60, 1.0  ;;  %v1714_v11 = vadd.f32 %v2336_v62, %v2272_v61  ;;  %v2275_v12 = vadd.f32 %v2274_v4, %v2273_v63 }
 0x27d   :  { %v1765_v14 = vadd.f32 %v3176_v1, %v1714_v11  ;;  %v1717_v15 = vadd.f32 %v2339_v13, %v2275_v12  ;;  %v1809_v16 = vpack.c.bf16 %v1796_v8, %v1795_v2 }
 0x27e   :  { %v2340_v20 = vpop.f32.mrb[48].mxu1 }
 0x27f   :  { %v1781_v17 = vmax.f32 %v1765_v14, 0.0  ;;  %v1766_v18 = vadd.f32 %v3176_v1, %v1717_v15  ;;  %v2276_v19 = vpop.f32.mrb[48].mxu0  ;;  %2391 = vmatprep.mubr.msk.bf16.mxu0 %vm1838_vm0, %v1809_v16  ;;  %v2341_v22 = vpop.f32.mrb[49].mxu1 }
 0x280   :  { %v2277_v21 = vpop.f32.mrb[49].mxu0  ;;  %v2342_v25 = vadd.f32 %v2341_v22, %v2340_v20  ;;  %v2343_v27 = vpop.f32.mrb[50].mxu1 }
 0x281   :  { %v1782_v23 = vmax.f32 %v1766_v18, 0.0  ;;  %v2278_v24 = vadd.f32 %v2277_v21, %v2276_v19  ;;  %v2279_v26 = vpop.f32.mrb[50].mxu0  ;;  %v1797_v28 = vmin.f32 %v1781_v17, 1.0  ;;  %v2344_v29 = vpop.f32.mrb[51].mxu1 }
 0x282   :  { %v2280_v3 = vpop.f32.mrb[51].mxu0  ;;  %v2345_v33 = vadd.f32 %v2344_v29, %v2343_v27 }
 0x283   :  { %v1798_v30 = vmin.f32 %v1782_v23, 1.0  ;;  %v1722_v31 = vadd.f32 %v2342_v25, %v2278_v24  ;;  %v2281_v32 = vadd.f32 %v2280_v3, %v2279_v26 }
 0x285   :  { %v1767_v34 = vadd.f32 %v3176_v1, %v1722_v31  ;;  %v1725_v35 = vadd.f32 %v2345_v33, %v2281_v32  ;;  %v1810_v36 = vpack.c.bf16 %v1798_v30, %v1797_v28 }
 0x286   :  { %v2346_v40 = vpop.f32.mrb[52].mxu1 }
 0x287   :  { %v1783_v37 = vmax.f32 %v1767_v34, 0.0  ;;  %v1768_v38 = vadd.f32 %v3176_v1, %v1725_v35  ;;  %v2282_v39 = vpop.f32.mrb[52].mxu0  ;;  %2392 = vmatmul.mubr.msk.bf16.gmra.mrb[68].mxu0 %vm1838_vm0, %v1810_v36  ;;  %v2347_v42 = vpop.f32.mrb[53].mxu1 }
 0x288   :  { %v2283_v41 = vpop.f32.mrb[53].mxu0  ;;  %v2348_v45 = vadd.f32 %v2347_v42, %v2346_v40  ;;  %v2349_v47 = vpop.f32.mrb[54].mxu1 }
 0x289   :  { %v1784_v43 = vmax.f32 %v1768_v38, 0.0  ;;  %v2284_v44 = vadd.f32 %v2283_v41, %v2282_v39  ;;  %v2285_v46 = vpop.f32.mrb[54].mxu0  ;;  %v1799_v48 = vmin.f32 %v1783_v37, 1.0  ;;  %v2350_v50 = vpop.f32.mrb[55].mxu1 }
 0x28a   :  { %v2286_v49 = vpop.f32.mrb[55].mxu0  ;;  %v2351_v53 = vadd.f32 %v2350_v50, %v2349_v47 }
 0x28b   :  { %v1800_v9 = vmin.f32 %v1784_v43, 1.0  ;;  %v1730_v51 = vadd.f32 %v2348_v45, %v2284_v44  ;;  %v2287_v52 = vadd.f32 %v2286_v49, %v2285_v46  ;;  %v2811_v45 = vmov 0.0   ;;  %v2001_v46 = vld [vmem:[#allocation2] sm:$0x1] }
 0x28c   :  { %2403 = vmatprep.subr.bf16.mxu1 %v2811_v45  ;;  %2419 = vmatprep.mubr.msk.bf16.mxu1 %vm2812_vm1, %v2811_v45 }
 0x28d   :  { %v1769_v54 = vadd.f32 %v3176_v1, %v1730_v51  ;;  %v1733_v55 = vadd.f32 %v2351_v53, %v2287_v52  ;;  %v1811_v56 = vpack.c.bf16 %v1800_v9, %v1799_v48  ;;  %2004 = vperm.xlu0 %2561, %v2001_v46  }
 0x28e   :  { %v2352_v59 = vpop.f32.mrb[56].mxu1 }
 0x28f   :  { %v1785_v57 = vmax.f32 %v1769_v54, 0.0  ;;  %v1770_v10 = vadd.f32 %v3176_v1, %v1733_v55  ;;  %v2288_v58 = vpop.f32.mrb[56].mxu0  ;;  %2395 = vmatprep.mubr.msk.bf16.mxu0 %vm1838_vm0, %v1811_v56  ;;  %v2353_v61 = vpop.f32.mrb[57].mxu1 }
 0x290   :  { %v2289_v60 = vpop.f32.mrb[57].mxu0  ;;  %v2354_v0 = vadd.f32 %v2353_v61, %v2352_v59  ;;  %v2355_v4 = vpop.f32.mrb[58].mxu1 }
 0x291   :  { %v1786_v62 = vmax.f32 %v1770_v10, 0.0  ;;  %v2290_v63 = vadd.f32 %v2289_v60, %v2288_v58  ;;  %v2291_v2 = vpop.f32.mrb[58].mxu0  ;;  %v1801_v7 = vmin.f32 %v1785_v57, 1.0  ;;  %v2356_v11 = vpop.f32.mrb[59].mxu1 }
 0x292   :  { %v2292_v8 = vpop.f32.mrb[59].mxu0  ;;  %v2357_v15 = vadd.f32 %v2356_v11, %v2355_v4 }
 0x293   :  { %v1802_v12 = vmin.f32 %v1786_v62, 1.0  ;;  %v1738_v13 = vadd.f32 %v2354_v0, %v2290_v63  ;;  %v2293_v14 = vadd.f32 %v2292_v8, %v2291_v2 }
 0x295   :  { %v1771_v16 = vadd.f32 %v3176_v1, %v1738_v13  ;;  %v1741_v17 = vadd.f32 %v2357_v15, %v2293_v14  ;;  %v1812_v18 = vpack.c.bf16 %v1802_v12, %v1801_v7 }
 0x296   :  { %v2358_v22 = vpop.f32.mrb[60].mxu1 }
 0x297   :  { %v1787_v19 = vmax.f32 %v1771_v16, 0.0  ;;  %v1772_v20 = vadd.f32 %v3176_v1, %v1741_v17  ;;  %v2294_v21 = vpop.f32.mrb[60].mxu0  ;;  %2396 = vmatmul.mubr.msk.bf16.gmra.mrb[72].mxu0 %vm1838_vm0, %v1812_v18  ;;  %v2359_v24 = vpop.f32.mrb[61].mxu1 }
 0x298   :  { %v2295_v23 = vpop.f32.mrb[61].mxu0  ;;  %v2360_v27 = vadd.f32 %v2359_v24, %v2358_v22  ;;  %v2361_v3 = vpop.f32.mrb[62].mxu1 }
 0x299   :  { %v1788_v25 = vmax.f32 %v1772_v20, 0.0  ;;  %v2296_v26 = vadd.f32 %v2295_v23, %v2294_v21  ;;  %v2297_v28 = vpop.f32.mrb[62].mxu0  ;;  %v1803_v29 = vmin.f32 %v1787_v19, 1.0  ;;  %v2362_v31 = vpop.f32.mrb[63].mxu1 }
 0x29a   :  { %v2298_v30 = vpop.f32.mrb[63].mxu0  ;;  %v2363_v35 = vadd.f32 %v2362_v31, %v2361_v3 }
 0x29b   :  { %v1804_v32 = vmin.f32 %v1788_v25, 1.0  ;;  %v1746_v33 = vadd.f32 %v2360_v27, %v2296_v26  ;;  %v2299_v34 = vadd.f32 %v2298_v30, %v2297_v28 }
 0x29d   :  { %v1773_v36 = vadd.f32 %v3176_v1, %v1746_v33  ;;  %v1749_v37 = vadd.f32 %v2363_v35, %v2299_v34  ;;  %v1813_v38 = vpack.c.bf16 %v1804_v32, %v1803_v29 }
 0x29f   :  { %v1789_v39 = vmax.f32 %v1773_v36, 0.0  ;;  %v1774_v40 = vadd.f32 %v3176_v1, %v1749_v37  ;;  %2399 = vmatprep.mubr.msk.bf16.mxu0 %vm1838_vm0, %v1813_v38  ;;  %v3207_v1 = vld [vmem:[%s3266_s8] ss:$0 sm:$0xff] }
 0x2a1   :  { %v1790_v41 = vmax.f32 %v1774_v40, 0.0  ;;  %v1805_v42 = vmin.f32 %v1789_v39, 1.0 }
 0x2a3   :  { %v1806_v43 = vmin.f32 %v1790_v41, 1.0 }
 0x2a5   :  { %v1814_v44 = vpack.c.bf16 %v1806_v43, %v1805_v42 }
 0x2a7   :  { %2400 = vmatmul.mubr.msk.bf16.gmra.mrb[76].mxu0 %vm1838_vm0, %v1814_v44 }
 0x34a   :  { %v2389_v47 = vpop.f32.mrb[64].mxu0 }
 0x34b   :  { %v1906_v48 = vadd.f32 %v2389_v47, %v3207_v1  ;;  %v1897_v49 = vpop.f32.mrb[65].mxu0 }
 0x34c   :  { %v1898_v50 = vadd.f32 %v3207_v1, %v1897_v49  ;;  %v2390_v9 = vpop.f32.mrb[66].mxu0 }
 0x34d   :  { %v1962_v51 = vmax.f32 %v1906_v48, 0.0  ;;  %v1909_v52 = vadd.f32 %v2390_v9, %v3207_v1  ;;  %v1900_v53 = vpop.f32.mrb[67].mxu0 }
 0x34e   :  { %v1960_v54 = vmax.f32 %v1898_v50, 0.0  ;;  %v1901_v55 = vadd.f32 %v3207_v1, %v1900_v53 }
 0x34f   :  { %v1963_v56 = vmax.f32 %v1909_v52, 0.0  ;;  %v1978_v10 = vmin.f32 %v1962_v51, 1.0 }
 0x350   :  { %v1961_v57 = vmax.f32 %v1901_v55, 0.0  ;;  %v1976_v59 = vmin.f32 %v1960_v54, 1.0 }
 0x351   :  { %v1979_v58 = vmin.f32 %v1963_v56, 1.0 }
 0x352   :  { %v1977_v60 = vmin.f32 %v1961_v57, 1.0 }
 0x353   :  { %v1993_v61 = vpack.c.bf16 %v1979_v58, %v1978_v10 }
 0x354   :  { %v1992_v62 = vpack.c.bf16 %v1977_v60, %v1976_v59 }
 0x355   :  { %v2018_v16 = vsel %vm1838_vm0, %v1993_v61, 0 }
 0x356   :  { %v2015_v63 = vsel %vm1838_vm0, %v1992_v62, 0 }
 0x357   :  { %2404 = vmatpush3.bf16.xpose.msra.mxu1 %v2015_v63 }
 0x358   :  { %2405 = vmatprep.subr.bf16.mxu1 %v2811_v45 }
 0x35a   :  { %v2393_v0 = vpop.f32.mrb[68].mxu0 }
 0x35b   :  { %v1922_v2 = vadd.f32 %v2393_v0, %v3207_v1  ;;  %v1913_v4 = vpop.f32.mrb[69].mxu0  ;;  %v2000_v0 = vld [vmem:[%s3267_s9] sm:$0x1] }
 0x35c   :  { %v1914_v7 = vadd.f32 %v3207_v1, %v1913_v4  ;;  %v2394_v8 = vpop.f32.mrb[70].mxu0 }
 0x35d   :  { %v1966_v11 = vmax.f32 %v1922_v2, 0.0  ;;  %v1925_v12 = vadd.f32 %v2394_v8, %v3207_v1  ;;  %v1916_v13 = vpop.f32.mrb[71].mxu0  ;;  %v2005_v2 = vpop.permute.xlu0 %2004 }
 0x35e   :  { %v1964_v14 = vmax.f32 %v1914_v7, 0.0  ;;  %v1917_v15 = vadd.f32 %v3207_v1, %v1916_v13  ;;  %v2010_v4 = vrot.slane %v2005_v2, %v154_v6 }
 0x35f   :  { %v1967_v17 = vmax.f32 %v1925_v12, 0.0  ;;  %2406 = vmatpush3.bf16.xpose.msra.mxu1 %v2018_v16  ;;  %v1982_v19 = vmin.f32 %v1966_v11, 1.0 }
 0x360   :  { %v1965_v18 = vmax.f32 %v1917_v15, 0.0  ;;  %2407 = vmatprep.subr.bf16.mxu1 %v2811_v45  ;;  %v1980_v21 = vmin.f32 %v1964_v14, 1.0 }
 0x361   :  { %v1983_v20 = vmin.f32 %v1967_v17, 1.0 }
 0x362   :  { %v1981_v22 = vmin.f32 %v1965_v18, 1.0 }
 0x363   :  { %v1995_v23 = vpack.c.bf16 %v1983_v20, %v1982_v19 }
 0x364   :  { %v1994_v24 = vpack.c.bf16 %v1981_v22, %v1980_v21 }
 0x365   :  { %v2024_v35 = vsel %vm1838_vm0, %v1995_v23, 0 }
 0x366   :  { %v2021_v25 = vsel %vm1838_vm0, %v1994_v24, 0 }
 0x367   :  { %2408 = vmatpush3.bf16.xpose.msra.mxu1 %v2021_v25 }
 0x368   :  { %2409 = vmatprep.subr.bf16.mxu1 %v2811_v45 }
 0x36a   :  { %v2397_v26 = vpop.f32.mrb[72].mxu0 }
 0x36b   :  { %v1938_v27 = vadd.f32 %v2397_v26, %v3207_v1  ;;  %v1929_v28 = vpop.f32.mrb[73].mxu0 }
 0x36c   :  { %v1930_v3 = vadd.f32 %v3207_v1, %v1929_v28  ;;  %v2398_v29 = vpop.f32.mrb[74].mxu0 }
 0x36d   :  { %v1970_v30 = vmax.f32 %v1938_v27, 0.0  ;;  %v1941_v31 = vadd.f32 %v2398_v29, %v3207_v1  ;;  %v1932_v32 = vpop.f32.mrb[75].mxu0 }
 0x36e   :  { %v1968_v33 = vmax.f32 %v1930_v3, 0.0  ;;  %v1933_v34 = vadd.f32 %v3207_v1, %v1932_v32 }
 0x36f   :  { %v1971_v36 = vmax.f32 %v1941_v31, 0.0  ;;  %2410 = vmatpush3.bf16.xpose.msra.mxu1 %v2024_v35  ;;  %v1986_v38 = vmin.f32 %v1970_v30, 1.0 }
 0x370   :  { %v1969_v37 = vmax.f32 %v1933_v34, 0.0  ;;  %2411 = vmatprep.subr.bf16.mxu1 %v2811_v45  ;;  %v1984_v40 = vmin.f32 %v1968_v33, 1.0 }
 0x371   :  { %v1987_v39 = vmin.f32 %v1971_v36, 1.0 }
 0x372   :  { %v1985_v41 = vmin.f32 %v1969_v37, 1.0 }
 0x373   :  { %v1997_v42 = vpack.c.bf16 %v1987_v39, %v1986_v38 }
 0x374   :  { %v1996_v43 = vpack.c.bf16 %v1985_v41, %v1984_v40 }
 0x375   :  { %v2030_v55 = vsel %vm1838_vm0, %v1997_v42, 0 }
 0x376   :  { %v2027_v44 = vsel %vm1838_vm0, %v1996_v43, 0 }
 0x377   :  { %2412 = vmatpush3.bf16.xpose.msra.mxu1 %v2027_v44 }
 0x378   :  { %2413 = vmatprep.subr.bf16.mxu1 %v2811_v45 }
 0x37a   :  { %v2401_v46 = vpop.f32.mrb[76].mxu0 }
 0x37b   :  { %v1954_v47 = vadd.f32 %v2401_v46, %v3207_v1  ;;  %v1945_v48 = vpop.f32.mrb[77].mxu0 }
 0x37c   :  { %v1946_v49 = vadd.f32 %v3207_v1, %v1945_v48  ;;  %v2402_v50 = vpop.f32.mrb[78].mxu0 }
 0x37d   :  { %v1974_v9 = vmax.f32 %v1954_v47, 0.0  ;;  %v1957_v51 = vadd.f32 %v2402_v50, %v3207_v1  ;;  %v1948_v52 = vpop.f32.mrb[79].mxu0 }
 0x37e   :  { %v1972_v53 = vmax.f32 %v1946_v49, 0.0  ;;  %v1949_v54 = vadd.f32 %v3207_v1, %v1948_v52 }
 0x37f   :  { %v1975_v56 = vmax.f32 %v1957_v51, 0.0  ;;  %2414 = vmatpush3.bf16.xpose.msra.mxu1 %v2030_v55  ;;  %v1990_v10 = vmin.f32 %v1974_v9, 1.0 }
 0x380   :  { %v1973_v57 = vmax.f32 %v1949_v54, 0.0  ;;  %2415 = vmatprep.subr.bf16.mxu1 %v2811_v45  ;;  %v1988_v59 = vmin.f32 %v1972_v53, 1.0 }
 0x381   :  { %v1991_v58 = vmin.f32 %v1975_v56, 1.0 }
 0x382   :  { %v1989_v60 = vmin.f32 %v1973_v57, 1.0 }
 0x383   :  { %v1999_v61 = vpack.c.bf16 %v1991_v58, %v1990_v10 }
 0x384   :  { %v1998_v62 = vpack.c.bf16 %v1989_v60, %v1988_v59 }
 0x385   :  { %v2036_v1 = vsel %vm1838_vm0, %v1999_v61, 0 }
 0x386   :  { %v2033_v63 = vsel %vm1838_vm0, %v1998_v62, 0 }
 0x387   :  { %2416 = vmatpush3.bf16.xpose.msra.mxu1 %v2033_v63 }
 0x388   :  { %2417 = vmatprep.subr.bf16.mxu1 %v2811_v45 }
 0x38f   :  { %2418 = vmatpush3.bf16.xpose.msra.mxu1 %v2036_v1 }
 0x396   :  { %2420 = vmatmul.mubr.msk.bf16.vlgmr.msra.gmra.mrb[64].mxu1 %vm1838_vm0, %v2000_v0 }
 0x469   :  { %v2072_v7 = vpop.f32.mrb[64].mxu1 }
 0x46a   :  { %v2073_v8 = vadd.f32 %v2072_v7, %v2010_v4  ;;  %v2421_v11 = vpop.f32.mrb[65].mxu1 }
 0x46b   :  { %v2075_v45 = vpop.f32.mrb[66].mxu1 }
 0x46c   :  { %2078 = vst [vmem:[#allocation8] sm:$0x1] %v2073_v8  ;;  %v2422_v12 = vpop.f32.mrb[67].mxu1 }
 0x46d   :  { %2787 = shalt.err (!%p2784_p6)
}
 0x46e   :  { %s2788_s17 = scalar_lea.hbm %s3269_s11, 16 }
 0x46f   :  { %p2789_p7 = scmp.ne.s32.totalorder %s3269_s11, %s2788_s17  ;;  %p2792_p8 = scmp.lt.u32.totalorder %s2788_s17, %s3269_s11 }
 0x471   :  { %p2794_p9 = pnand %p2792_p8, %p2789_p7 }
 0x473   :  { %2797 = shalt.err (!%p2794_p9)
}
 0x474   :  { %2088 = dma.vmem_to_hbm [thread:$0]  %s2086_s13, 16, %s3269_s11, [#allocation5]  }
 0x475   :  { %2802 = dma.done.wait [#allocation5], 16  }
 0x476   :  { %2803 = vsyncadd [#allocation5], 4294967280 }
 0x477   :  { %2092 = vsyncpa [#allocation4], 1 }
 0x478   :  { %2093 = vsyncpa [#allocation7], 1 }
 0x479   :  { %2094 = vsyncpa [#allocation5], 1 }

</bundles_post_ra>
